<compile_context>
chip_gen: v7x
topology: tpu7x:2x2x1
jax: 0.10.0
libtpu: 0.0.40
codegen_flags: <defaults>
</compile_context>

<pallas_src>
import functools

import jax
import jax.numpy as jnp
from jax.experimental import pallas as pl
from jax.experimental.pallas import tpu as pltpu

LN_EPS = 1e-5
NEG_LARGE = -1e30  # finite -inf substitute (avoids NaN for fully masked rows)

# Tile targets (divisible by (8, 128) alignment); actual tiles shrink to the
# full dim for small problems.
TM_DEFAULT = 256
TN_DEFAULT = 256
TK_DEFAULT = 512


def _round_up(x, m):
    return ((x + m - 1) // m) * m


def _choose_tile(dim, target):
    """Return (tile, padded_dim). tile == dim (no padding) if dim <= target."""
    if dim <= target:
        return dim, dim
    return target, _round_up(dim, target)


def _pad2d(x, rows, cols, value=0.0):
    r, c = x.shape
    if r == rows and c == cols:
        return x
    return jnp.pad(x, ((0, rows - r), (0, cols - c)), constant_values=value)


# ---------------------------------------------------------------------------
# Pallas kernels
# ---------------------------------------------------------------------------
def _matmul_bias_kernel(x_ref, w_ref, b_ref, o_ref, acc_ref, *, relu):
    # grid = (Mt, Nt, Kt); K is the reduction ("arbitrary") axis.
    @pl.when(pl.program_id(2) == 0)
    def _():
        acc_ref[...] = jnp.zeros_like(acc_ref)

    acc_ref[...] += jnp.dot(
        x_ref[...].astype(jnp.bfloat16),
        w_ref[...],  # stored bf16
        preferred_element_type=jnp.float32,
    )

    @pl.when(pl.program_id(2) == pl.num_programs(2) - 1)
    def _():
        y = acc_ref[...] + b_ref[...]
        if relu:
            y = jnp.maximum(y, 0.0)
        o_ref[...] = y


def _matmul_res_ln_kernel(x_ref, w_ref, b_ref, res_ref, g_ref, be_ref,
                          o_ref, acc_ref, *, eps):
    # grid = (Mt, Kt); output N dim (== d_model) kept whole so LN can reduce it.
    @pl.when(pl.program_id(1) == 0)
    def _():
        acc_ref[...] = jnp.zeros_like(acc_ref)

    acc_ref[...] += jnp.dot(
        x_ref[...].astype(jnp.bfloat16),
        w_ref[...],
        preferred_element_type=jnp.float32,
    )

    @pl.when(pl.program_id(1) == pl.num_programs(1) - 1)
    def _():
        y = acc_ref[...] + b_ref[...] + res_ref[...]
        mu = jnp.mean(y, axis=-1, keepdims=True)
        var = jnp.mean((y - mu) ** 2, axis=-1, keepdims=True)
        o_ref[...] = (y - mu) * jax.lax.rsqrt(var + eps) * g_ref[...] + be_ref[...]


def _attn_kernel(q_ref, k_ref, v_ref, m_ref, o_ref, *, scale):
    # q: (H, Tq, dh), k/v: (H, Tk, dh), m: (1, Tk) float (nonzero => masked key)
    q = q_ref[...].astype(jnp.bfloat16)
    k = k_ref[...].astype(jnp.bfloat16)
    v = v_ref[...].astype(jnp.bfloat16)
    s = jnp.einsum("hqd,hkd->hqk", q, k,
                   preferred_element_type=jnp.float32) * scale     # (H, Tq, Tk)
    mask = m_ref[...]                                              # (1, Tk)
    s = jnp.where(mask[None, :, :] > 0.5, jnp.float32(NEG_LARGE), s)
    m = jnp.max(s, axis=-1, keepdims=True)
    p = jnp.exp(s - m)
    l = jnp.sum(p, axis=-1, keepdims=True)
    ctx = jnp.einsum("hqk,hkd->hqd", p.astype(jnp.bfloat16), v,
                     preferred_element_type=jnp.float32)           # (H, Tq, dh)
    o_ref[...] = ctx * pl.reciprocal(l, approx=True)


# ---------------------------------------------------------------------------
# pallas_call wrappers
# ---------------------------------------------------------------------------
def linear(x2d, w, b, relu=False, tm=TM_DEFAULT, tn=TN_DEFAULT, tk=TK_DEFAULT):
    """(M, K) @ (K, N) + b, optional ReLU. Tiled & pipelined, bf16 MXU path."""
    M, K = x2d.shape
    N = w.shape[1]
    tm, Mp = _choose_tile(M, tm)
    tn, Np = _choose_tile(N, tn)
    tk, Kp = _choose_tile(K, tk)

    xp = _pad2d(x2d, Mp, Kp)
    wp = _pad2d(w, Kp, Np)
    bp = _pad2d(b.reshape(1, N), 1, Np)

    out = pl.pallas_call(
        functools.partial(_matmul_bias_kernel, relu=relu),
        out_shape=jax.ShapeDtypeStruct((Mp, Np), jnp.float32),
        grid=(Mp // tm, Np // tn, Kp // tk),
        in_specs=[
            pl.BlockSpec((tm, tk), lambda i, j, k: (i, k)),
            pl.BlockSpec((tk, tn), lambda i, j, k: (k, j)),
            pl.BlockSpec((1, tn), lambda i, j, k: (0, j)),
        ],
        out_specs=pl.BlockSpec((tm, tn), lambda i, j, k: (i, j)),
        scratch_shapes=[pltpu.VMEM((tm, tn), jnp.float32)],
        compiler_params=pltpu.CompilerParams(
            dimension_semantics=("parallel", "parallel", "arbitrary")),
    )(xp, wp, bp)
    return out[:M, :N]


def linear_res_ln(x2d, w, b, res2d, gamma, beta,
                  tm=TM_DEFAULT, tk=TK_DEFAULT):
    """Fused: LayerNorm(res + (x @ w + b)). Output feature dim kept whole."""
    M, K = x2d.shape
    N = w.shape[1]
    tm, Mp = _choose_tile(M, tm)
    tk, Kp = _choose_tile(K, tk)

    xp = _pad2d(x2d, Mp, Kp)
    wp = _pad2d(w, Kp, N)
    rp = _pad2d(res2d, Mp, N)

    out = pl.pallas_call(
        functools.partial(_matmul_res_ln_kernel, eps=LN_EPS),
        out_shape=jax.ShapeDtypeStruct((Mp, N), jnp.float32),
        grid=(Mp // tm, Kp // tk),
        in_specs=[
            pl.BlockSpec((tm, tk), lambda i, k: (i, k)),
            pl.BlockSpec((tk, N), lambda i, k: (k, 0)),
            pl.BlockSpec((1, N), lambda i, k: (0, 0)),
            pl.BlockSpec((tm, N), lambda i, k: (i, 0)),
            pl.BlockSpec((1, N), lambda i, k: (0, 0)),
            pl.BlockSpec((1, N), lambda i, k: (0, 0)),
        ],
        out_specs=pl.BlockSpec((tm, N), lambda i, k: (i, 0)),
        scratch_shapes=[pltpu.VMEM((tm, N), jnp.float32)],
        compiler_params=pltpu.CompilerParams(
            dimension_semantics=("parallel", "arbitrary")),
    )(xp, wp, b.reshape(1, N), rp, gamma.reshape(1, N), beta.reshape(1, N))
    return out[:M]


def attention(q, k, v, key_mask, num_heads):
    """q: (B, Tq, D); k, v: (B, Tk, D); key_mask: (B, Tk), nonzero = masked key."""
    B, Tq, D = q.shape
    Tk = k.shape[1]
    dh = D // num_heads
    scale = dh ** -0.5

    # Lane-pad keys to a multiple of 128 (padded keys are masked); sublane-pad
    # queries to a multiple of 8 (padded rows sliced off afterwards).
    Tqp = _round_up(Tq, 8)
    Tkp = _round_up(Tk, 128)
    if Tqp != Tq:
        q = jnp.pad(q, ((0, 0), (0, Tqp - Tq), (0, 0)))
    if Tkp != Tk:
        k = jnp.pad(k, ((0, 0), (0, Tkp - Tk), (0, 0)))
        v = jnp.pad(v, ((0, 0), (0, Tkp - Tk), (0, 0)))
    m = jnp.pad(key_mask.astype(jnp.float32), ((0, 0), (0, Tkp - Tk)),
                constant_values=1.0).reshape(B, 1, Tkp)

    def split_heads(x, T):
        return x.reshape(B, T, num_heads, dh).transpose(0, 2, 1, 3)

    qh = split_heads(q, Tqp)
    kh = split_heads(k, Tkp)
    vh = split_heads(v, Tkp)

    out = pl.pallas_call(
        functools.partial(_attn_kernel, scale=scale),
        out_shape=jax.ShapeDtypeStruct((B, num_heads, Tqp, dh), jnp.float32),
        grid=(B,),  # all heads of one batch element per grid step
        in_specs=[
            pl.BlockSpec((None, num_heads, Tqp, dh), lambda b: (b, 0, 0, 0)),
            pl.BlockSpec((None, num_heads, Tkp, dh), lambda b: (b, 0, 0, 0)),
            pl.BlockSpec((None, num_heads, Tkp, dh), lambda b: (b, 0, 0, 0)),
            pl.BlockSpec((None, 1, Tkp), lambda b: (b, 0, 0)),
        ],
        out_specs=pl.BlockSpec((None, num_heads, Tqp, dh), lambda b: (b, 0, 0, 0)),
        compiler_params=pltpu.CompilerParams(dimension_semantics=("parallel",)),
    )(qh, kh, vh, m)

    out = out.transpose(0, 2, 1, 3)[:, :Tq]          # (B, Tq, H, dh)
    return out.reshape(B, Tq, D)


# ---------------------------------------------------------------------------
# Decoder forward (glue in plain JAX, compute in Pallas)
# ---------------------------------------------------------------------------
def transformer_decoder_forward(params, src, src_mask, tgt, tgt_mask, num_heads):
    # matches TransformerDecoder.forward: non_pad_mask = 1 - mask, then layers.
    non_pad_src = 1.0 - src_mask.astype(jnp.float32)
    non_pad_tgt = 1.0 - tgt_mask.astype(jnp.float32)
    x = tgt
    enc = src
    B, T, D = x.shape
    S = enc.shape[1]

    for lp in params["layers"]:
        # --- self attention: fused QKV proj -> attn -> fused out-proj+res+LN ---
        sa = lp["self_attn"]
        x2 = x.reshape(-1, D)
        qkv = linear(x2, sa["w_qkv"], sa["b_qkv"])
        q = qkv[:, :D].reshape(B, T, D)
        k = qkv[:, D:2 * D].reshape(B, T, D)
        v = qkv[:, 2 * D:].reshape(B, T, D)
        ctx = attention(q, k, v, non_pad_tgt, num_heads)
        x = linear_res_ln(ctx.reshape(-1, D), sa["wo"], sa["bo"], x2,
                          lp["self_ln_g"], lp["self_ln_b"]).reshape(B, T, D)

        # --- encoder (cross) attention: q proj, fused KV proj, fused out+res+LN ---
        ca = lp["enc_attn"]
        x2 = x.reshape(-1, D)
        q = linear(x2, ca["wq"], ca["bq"]).reshape(B, T, D)
        kv = linear(enc.reshape(-1, D), ca["w_kv"], ca["b_kv"])
        k = kv[:, :D].reshape(B, S, D)
        v = kv[:, D:].reshape(B, S, D)
        ctx = attention(q, k, v, non_pad_src, num_heads)
        x = linear_res_ln(ctx.reshape(-1, D), ca["wo"], ca["bo"], x2,
                          lp["enc_ln_g"], lp["enc_ln_b"]).reshape(B, T, D)

        # --- feed-forward: fc1+relu, fused fc2+res+LN ---
        x2 = x.reshape(-1, D)
        h = linear(x2, lp["fc1_w"], lp["fc1_b"], relu=True)
        x = linear_res_ln(h, lp["fc2_w"], lp["fc2_b"], x2,
                          lp["final_ln_g"], lp["final_ln_b"]).reshape(B, T, D)

    # NOTE: attention weights (second return of each layer) are unused by the
    # decoder's outer forward, so they are not materialized.
    return x


# ---------------------------------------------------------------------------
# Deterministic parameter init (matmul weights stored bf16 for the MXU path)
# ---------------------------------------------------------------------------
def init_params(key, num_layers, d_model):
    d_ff = d_model << 1

    def lin(k, din, dout):
        k1, k2 = jax.random.split(k)
        w = (0.05 * jax.random.normal(k1, (din, dout), jnp.float32)).astype(jnp.bfloat16)
        b = 0.05 * jax.random.normal(k2, (dout,), jnp.float32)
        return w, b

    layers = []
    for _ in range(num_layers):
        key, *ks = jax.random.split(key, 9)

        w_qkv, b_qkv = lin(ks[0], d_model, 3 * d_model)
        wo_s, bo_s = lin(ks[1], d_model, d_model)
        wq_c, bq_c = lin(ks[2], d_model, d_model)
        w_kv, b_kv = lin(ks[3], d_model, 2 * d_model)
        wo_c, bo_c = lin(ks[4], d_model, d_model)
        fc1_w, fc1_b = lin(ks[5], d_model, d_ff)
        fc2_w, fc2_b = lin(ks[6], d_ff, d_model)

        layers.append(
            dict(
                self_attn=dict(w_qkv=w_qkv, b_qkv=b_qkv, wo=wo_s, bo=bo_s),
                enc_attn=dict(wq=wq_c, bq=bq_c, w_kv=w_kv, b_kv=b_kv,
                              wo=wo_c, bo=bo_c),
                self_ln_g=jnp.ones((d_model,), jnp.float32),
                self_ln_b=jnp.zeros((d_model,), jnp.float32),
                enc_ln_g=jnp.ones((d_model,), jnp.float32),
                enc_ln_b=jnp.zeros((d_model,), jnp.float32),
                final_ln_g=jnp.ones((d_model,), jnp.float32),
                final_ln_b=jnp.zeros((d_model,), jnp.float32),
                fc1_w=fc1_w,
                fc1_b=fc1_b,
                fc2_w=fc2_w,
                fc2_b=fc2_b,
            )
        )
    return dict(layers=layers)


# ---------------------------------------------------------------------------
if __name__ == "__main__":
    NUM_LAYERS = 2
    D_MODEL = 32
    NUM_HEADS = 4
    B, S, T = 2, 12, 8  # batch, encoder seq, decoder seq

    key = jax.random.PRNGKey(0)
    kp, ks, kt = jax.random.split(key, 3)

    params = init_params(kp, NUM_LAYERS, D_MODEL)

    src = jax.random.normal(ks, (B, S, D_MODEL), jnp.float32)
    tgt = jax.random.normal(kt, (B, T, D_MODEL), jnp.float32)
    # masks: 1 = valid token, 0 = pad (so non_pad = 1 - mask is nonzero at pads)
    src_mask = jnp.concatenate(
        [jnp.ones((B, S - 2), jnp.float32), jnp.zeros((B, 2), jnp.float32)], axis=1
    )
    tgt_mask = jnp.concatenate(
        [jnp.ones((B, T - 1), jnp.float32), jnp.zeros((B, 1), jnp.float32)], axis=1
    )

    fwd = jax.jit(functools.partial(transformer_decoder_forward,
                                    num_heads=NUM_HEADS))
    out = fwd(params, src, src_mask, tgt, tgt_mask)
    out = jax.block_until_ready(out)
    assert out.shape == (B, T, D_MODEL)
    assert bool(jnp.all(jnp.isfinite(out)))
    print("KERNEL_OK")
</pallas_src>

<mosaic_0001>
module attributes {stable_mosaic.version = 11 : i64} {
  func.func @_matmul_bias_kernel(%arg0: i32, %arg1: i32, %arg2: i32, %arg3: memref<16x32xf32, #tpu.memory_space<vmem>>, %arg4: memref<32x96xbf16, #tpu.memory_space<vmem>>, %arg5: memref<1x96xf32, #tpu.memory_space<vmem>>, %arg6: memref<16x96xf32, #tpu.memory_space<vmem>>, %arg7: memref<16x96xf32, #tpu.memory_space<vmem>>) attributes {dimension_semantics = [#tpu.dimension_semantics<parallel>, #tpu.dimension_semantics<parallel>, #tpu.dimension_semantics<arbitrary>], iteration_bounds = array<i64: 1, 1, 1>, scalar_prefetch = 0 : i64, scratch_operands = 1 : i64, tpu.core_type = #tpu.core_type<tc>, window_params = [{transform_indices = @transform_0, window_bounds = array<i64: 16, 32>}, {transform_indices = @transform_1, window_bounds = array<i64: 32, 96>}, {transform_indices = @transform_2, window_bounds = array<i64: 1, 96>}, {transform_indices = @transform_3, window_bounds = array<i64: 16, 96>}]} {
    %c0_i32 = arith.constant 0 : i32
    %0 = arith.cmpi eq, %arg2, %c0_i32 : i32
    %1 = arith.extui %0 : i1 to i32
    %c0_i32_0 = arith.constant 0 : i32
    %2 = arith.cmpi ne, %1, %c0_i32_0 : i32
    scf.if %2 {
      %cst_10 = arith.constant 0.000000e+00 : f32
      %13 = vector.broadcast %cst_10 : f32 to vector<16x96xf32>
      %c0_11 = arith.constant 0 : index
      %c0_12 = arith.constant 0 : index
      %14 = vector.load %arg7[%c0_11, %c0_12] : memref<16x96xf32, #tpu.memory_space<vmem>>, vector<16x96xf32>
      tpu.vector_store %arg7[%c0_11, %c0_12], %13 {strides = array<i32>} : memref<16x96xf32, #tpu.memory_space<vmem>>, vector<16x96xf32>,
    } else {
    }
    %c0 = arith.constant 0 : index
    %c0_1 = arith.constant 0 : index
    %3 = vector.load %arg7[%c0, %c0_1] : memref<16x96xf32, #tpu.memory_space<vmem>>, vector<16x96xf32>
    %c0_2 = arith.constant 0 : index
    %c0_3 = arith.constant 0 : index
    %4 = vector.load %arg3[%c0_2, %c0_3] : memref<16x32xf32, #tpu.memory_space<vmem>>, vector<16x32xf32>
    %5 = arith.truncf %4 : vector<16x32xf32> to vector<16x32xbf16>
    %c0_4 = arith.constant 0 : index
    %c0_5 = arith.constant 0 : index
    %6 = vector.load %arg4[%c0_4, %c0_5] : memref<32x96xbf16, #tpu.memory_space<vmem>>, vector<32x96xbf16>
    %cst = arith.constant dense<0.000000e+00> : vector<16x96xf32>
    %7 = tpu.matmul %5, %6, %cst {dimension_numbers = #tpu.dot_dimension_numbers<[1], [0], [0], [1], [0, 0, 1, 1], [], []>} : vector<16x32xbf16>, vector<32x96xbf16>, vector<16x96xf32> -> vector<16x96xf32>
    %8 = arith.addf %3, %7 : vector<16x96xf32>
    %c0_6 = arith.constant 0 : index
    %c0_7 = arith.constant 0 : index
    %9 = vector.load %arg7[%c0_6, %c0_7] : memref<16x96xf32, #tpu.memory_space<vmem>>, vector<16x96xf32>
    tpu.vector_store %arg7[%c0_6, %c0_7], %8 {strides = array<i32>} : memref<16x96xf32, #tpu.memory_space<vmem>>, vector<16x96xf32>,
    %c0_i32_8 = arith.constant 0 : i32
    %10 = arith.cmpi eq, %arg2, %c0_i32_8 : i32
    %11 = arith.extui %10 : i1 to i32
    %c0_i32_9 = arith.constant 0 : i32
    %12 = arith.cmpi ne, %11, %c0_i32_9 : i32
    scf.if %12 {
      %c0_10 = arith.constant 0 : index
      %c0_11 = arith.constant 0 : index
      %13 = vector.load %arg7[%c0_10, %c0_11] : memref<16x96xf32, #tpu.memory_space<vmem>>, vector<16x96xf32>
      %c0_12 = arith.constant 0 : index
      %c0_13 = arith.constant 0 : index
      %14 = vector.load %arg5[%c0_12, %c0_13] : memref<1x96xf32, #tpu.memory_space<vmem>>, vector<1x96xf32>
      %15 = vector.broadcast %14 : vector<1x96xf32> to vector<16x96xf32>
      %16 = arith.addf %13, %15 : vector<16x96xf32>
      %c0_14 = arith.constant 0 : index
      %c0_15 = arith.constant 0 : index
      %17 = vector.load %arg6[%c0_14, %c0_15] : memref<16x96xf32, #tpu.memory_space<vmem>>, vector<16x96xf32>
      tpu.vector_store %arg6[%c0_14, %c0_15], %16 {strides = array<i32>} : memref<16x96xf32, #tpu.memory_space<vmem>>, vector<16x96xf32>,
    } else {
    }
    return
  }
  func.func @transform_0(%arg0: i32, %arg1: i32, %arg2: i32) -> (i32, i32) {
    %c0_i32 = arith.constant 0 : i32
    return %arg0, %arg2 : i32, i32
  }
  func.func @transform_1(%arg0: i32, %arg1: i32, %arg2: i32) -> (i32, i32) {
    %c0_i32 = arith.constant 0 : i32
    return %arg2, %arg1 : i32, i32
  }
  func.func @transform_2(%arg0: i32, %arg1: i32, %arg2: i32) -> (i32, i32) {
    %c0_i32 = arith.constant 0 : i32
    %c0_i32_0 = arith.constant 0 : i32
    return %c0_i32, %arg1 : i32, i32
  }
  func.func @transform_3(%arg0: i32, %arg1: i32, %arg2: i32) -> (i32, i32) {
    %c0_i32 = arith.constant 0 : i32
    return %arg0, %arg1 : i32, i32
  }
}

module attributes {stable_mosaic.version = 11 : i64} {
  func.func @_attn_kernel(%arg0: i32, %arg1: memref<1x4x8x8xf32, #tpu.memory_space<vmem>>, %arg2: memref<1x4x128x8xf32, #tpu.memory_space<vmem>>, %arg3: memref<1x4x128x8xf32, #tpu.memory_space<vmem>>, %arg4: memref<1x1x128xf32, #tpu.memory_space<vmem>>, %arg5: memref<1x4x8x8xf32, #tpu.memory_space<vmem>>) attributes {dimension_semantics = [#tpu.dimension_semantics<parallel>], iteration_bounds = array<i64: 2>, scalar_prefetch = 0 : i64, scratch_operands = 0 : i64, tpu.core_type = #tpu.core_type<tc>, window_params = [{transform_indices = @transform_0, window_bounds = array<i64: 1, 4, 8, 8>}, {transform_indices = @transform_1, window_bounds = array<i64: 1, 4, 128, 8>}, {transform_indices = @transform_2, window_bounds = array<i64: 1, 4, 128, 8>}, {transform_indices = @transform_3, window_bounds = array<i64: 1, 1, 128>}, {transform_indices = @transform_4, window_bounds = array<i64: 1, 4, 8, 8>}]} {
    %c0 = arith.constant 0 : index
    %c0_0 = arith.constant 0 : index
    %c0_1 = arith.constant 0 : index
    %c0_2 = arith.constant 0 : index
    %0 = vector.load %arg1[%c0, %c0_0, %c0_1, %c0_2] : memref<1x4x8x8xf32, #tpu.memory_space<vmem>>, vector<1x4x8x8xf32>
    %1 = vector.shape_cast %0 : vector<1x4x8x8xf32> to vector<4x8x8xf32>
    %2 = arith.truncf %1 : vector<4x8x8xf32> to vector<4x8x8xbf16>
    %c0_3 = arith.constant 0 : index
    %c0_4 = arith.constant 0 : index
    %c0_5 = arith.constant 0 : index
    %c0_6 = arith.constant 0 : index
    %3 = vector.load %arg2[%c0_3, %c0_4, %c0_5, %c0_6] : memref<1x4x128x8xf32, #tpu.memory_space<vmem>>, vector<1x4x128x8xf32>
    %4 = vector.shape_cast %3 : vector<1x4x128x8xf32> to vector<4x128x8xf32>
    %5 = arith.truncf %4 : vector<4x128x8xf32> to vector<4x128x8xbf16>
    %c0_7 = arith.constant 0 : index
    %c0_8 = arith.constant 0 : index
    %c0_9 = arith.constant 0 : index
    %c0_10 = arith.constant 0 : index
    %6 = vector.load %arg3[%c0_7, %c0_8, %c0_9, %c0_10] : memref<1x4x128x8xf32, #tpu.memory_space<vmem>>, vector<1x4x128x8xf32>
    %7 = vector.shape_cast %6 : vector<1x4x128x8xf32> to vector<4x128x8xf32>
    %8 = arith.truncf %7 : vector<4x128x8xf32> to vector<4x128x8xbf16>
    "tpu.trace_start"() <{level = 10 : i32, message = "hqd,hkd->hqk"}> : () -> ()
    %cst = arith.constant dense<0.000000e+00> : vector<4x8x128xf32>
    %9 = tpu.matmul %2, %5, %cst {dimension_numbers = #tpu.dot_dimension_numbers<[2], [2], [1], [1], [0, 0, 0, 1, 1, 1], [0], [0]>} : vector<4x8x8xbf16>, vector<4x128x8xbf16>, vector<4x8x128xf32> -> vector<4x8x128xf32>
    "tpu.trace_stop"() : () -> ()
    %cst_11 = arith.constant 0.353553385 : f32
    %10 = vector.broadcast %cst_11 : f32 to vector<4x8x128xf32>
    %11 = arith.mulf %9, %10 : vector<4x8x128xf32>
    %c0_12 = arith.constant 0 : index
    %c0_13 = arith.constant 0 : index
    %c0_14 = arith.constant 0 : index
    %12 = vector.load %arg4[%c0_12, %c0_13, %c0_14] : memref<1x1x128xf32, #tpu.memory_space<vmem>>, vector<1x1x128xf32>
    %13 = vector.shape_cast %12 : vector<1x1x128xf32> to vector<1x128xf32>
    %14 = vector.shape_cast %13 : vector<1x128xf32> to vector<1x1x128xf32>
    %cst_15 = arith.constant 5.000000e-01 : f32
    %15 = vector.broadcast %cst_15 : f32 to vector<1x1x128xf32>
    %16 = arith.cmpf ogt, %14, %15 : vector<1x1x128xf32>
    %cst_16 = arith.constant -1.000000e+30 : f32
    %17 = vector.shape_cast %16 : vector<1x1x128xi1> to vector<1x1x128xi1>
    %18 = vector.broadcast %17 : vector<1x1x128xi1> to vector<4x8x128xi1>
    %19 = vector.broadcast %cst_16 : f32 to vector<4x8x128xf32>
    %20 = arith.select %18, %19, %11 : vector<4x8x128xi1>, vector<4x8x128xf32>
    %cst_17 = arith.constant dense<0xFF800000> : vector<4x8xf32>
    %21 = vector.multi_reduction <maximumf>, %20, %cst_17 [2] : vector<4x8x128xf32> to vector<4x8xf32>
    %22 = vector.shape_cast %21 : vector<4x8xf32> to vector<4x8x1xf32>
    %23 = vector.broadcast %22 : vector<4x8x1xf32> to vector<4x8x128xf32>
    %24 = arith.subf %20, %23 : vector<4x8x128xf32>
    %25 = math.exp %24 : vector<4x8x128xf32>
    %cst_18 = arith.constant dense<0.000000e+00> : vector<4x8xf32>
    %26 = vector.multi_reduction <add>, %25, %cst_18 [2] : vector<4x8x128xf32> to vector<4x8xf32>
    %27 = vector.shape_cast %26 : vector<4x8xf32> to vector<4x8x1xf32>
    %28 = arith.truncf %25 : vector<4x8x128xf32> to vector<4x8x128xbf16>
    "tpu.trace_start"() <{level = 10 : i32, message = "hqk,hkd->hqd"}> : () -> ()
    %cst_19 = arith.constant dense<0.000000e+00> : vector<4x8x8xf32>
    %29 = tpu.matmul %28, %8, %cst_19 {dimension_numbers = #tpu.dot_dimension_numbers<[2], [1], [1], [2], [0, 0, 0, 1, 1, 2], [0], [0]>} : vector<4x8x128xbf16>, vector<4x128x8xbf16>, vector<4x8x8xf32> -> vector<4x8x8xf32>
    "tpu.trace_stop"() : () -> ()
    %30 = tpu.reciprocal %27 {approx = true} : vector<4x8x1xf32> -> vector<4x8x1xf32>
    %31 = vector.broadcast %30 : vector<4x8x1xf32> to vector<4x8x8xf32>
    %32 = arith.mulf %29, %31 : vector<4x8x8xf32>
    %c0_20 = arith.constant 0 : index
    %c0_21 = arith.constant 0 : index
    %c0_22 = arith.constant 0 : index
    %c0_23 = arith.constant 0 : index
    %33 = vector.load %arg5[%c0_20, %c0_21, %c0_22, %c0_23] : memref<1x4x8x8xf32, #tpu.memory_space<vmem>>, vector<1x4x8x8xf32>
    %34 = vector.shape_cast %33 : vector<1x4x8x8xf32> to vector<4x8x8xf32>
    %35 = vector.shape_cast %32 : vector<4x8x8xf32> to vector<1x4x8x8xf32>
    tpu.vector_store %arg5[%c0_20, %c0_21, %c0_22, %c0_23], %35 {strides = array<i32>} : memref<1x4x8x8xf32, #tpu.memory_space<vmem>>, vector<1x4x8x8xf32>,
    return
  }
  func.func @transform_0(%arg0: i32) -> (i32, i32, i32, i32) {
    %c0_i32 = arith.constant 0 : i32
    %c0_i32_0 = arith.constant 0 : i32
    %c0_i32_1 = arith.constant 0 : i32
    %c0_i32_2 = arith.constant 0 : i32
    return %arg0, %c0_i32, %c0_i32_0, %c0_i32_1 : i32, i32, i32, i32
  }
  func.func @transform_1(%arg0: i32) -> (i32, i32, i32, i32) {
    %c0_i32 = arith.constant 0 : i32
    %c0_i32_0 = arith.constant 0 : i32
    %c0_i32_1 = arith.constant 0 : i32
    %c0_i32_2 = arith.constant 0 : i32
    return %arg0, %c0_i32, %c0_i32_0, %c0_i32_1 : i32, i32, i32, i32
  }
  func.func @transform_2(%arg0: i32) -> (i32, i32, i32, i32) {
    %c0_i32 = arith.constant 0 : i32
    %c0_i32_0 = arith.constant 0 : i32
    %c0_i32_1 = arith.constant 0 : i32
    %c0_i32_2 = arith.constant 0 : i32
    return %arg0, %c0_i32, %c0_i32_0, %c0_i32_1 : i32, i32, i32, i32
  }
  func.func @transform_3(%arg0: i32) -> (i32, i32, i32) {
    %c0_i32 = arith.constant 0 : i32
    %c0_i32_0 = arith.constant 0 : i32
    %c0_i32_1 = arith.constant 0 : i32
    return %arg0, %c0_i32, %c0_i32_0 : i32, i32, i32
  }
  func.func @transform_4(%arg0: i32) -> (i32, i32, i32, i32) {
    %c0_i32 = arith.constant 0 : i32
    %c0_i32_0 = arith.constant 0 : i32
    %c0_i32_1 = arith.constant 0 : i32
    %c0_i32_2 = arith.constant 0 : i32
    return %arg0, %c0_i32, %c0_i32_0, %c0_i32_1 : i32, i32, i32, i32
  }
}

module attributes {stable_mosaic.version = 11 : i64} {
  func.func @_matmul_res_ln_kernel(%arg0: i32, %arg1: i32, %arg2: memref<16x32xf32, #tpu.memory_space<vmem>>, %arg3: memref<32x32xbf16, #tpu.memory_space<vmem>>, %arg4: memref<1x32xf32, #tpu.memory_space<vmem>>, %arg5: memref<16x32xf32, #tpu.memory_space<vmem>>, %arg6: memref<1x32xf32, #tpu.memory_space<vmem>>, %arg7: memref<1x32xf32, #tpu.memory_space<vmem>>, %arg8: memref<16x32xf32, #tpu.memory_space<vmem>>, %arg9: memref<16x32xf32, #tpu.memory_space<vmem>>) attributes {dimension_semantics = [#tpu.dimension_semantics<parallel>, #tpu.dimension_semantics<arbitrary>], iteration_bounds = array<i64: 1, 1>, scalar_prefetch = 0 : i64, scratch_operands = 1 : i64, tpu.core_type = #tpu.core_type<tc>, window_params = [{transform_indices = @transform_0, window_bounds = array<i64: 16, 32>}, {transform_indices = @transform_1, window_bounds = array<i64: 32, 32>}, {pipeline_mode = #tpu.pipeline_mode<synchronous>, transform_indices = @transform_2, window_bounds = array<i64: 1, 32>}, {transform_indices = @transform_3, window_bounds = array<i64: 16, 32>}, {pipeline_mode = #tpu.pipeline_mode<synchronous>, transform_indices = @transform_4, window_bounds = array<i64: 1, 32>}, {pipeline_mode = #tpu.pipeline_mode<synchronous>, transform_indices = @transform_5, window_bounds = array<i64: 1, 32>}, {transform_indices = @transform_6, window_bounds = array<i64: 16, 32>}]} {
    %c0_i32 = arith.constant 0 : i32
    %0 = arith.cmpi eq, %arg1, %c0_i32 : i32
    %1 = arith.extui %0 : i1 to i32
    %c0_i32_0 = arith.constant 0 : i32
    %2 = arith.cmpi ne, %1, %c0_i32_0 : i32
    scf.if %2 {
      %cst_10 = arith.constant 0.000000e+00 : f32
      %13 = vector.broadcast %cst_10 : f32 to vector<16x32xf32>
      %c0_11 = arith.constant 0 : index
      %c0_12 = arith.constant 0 : index
      %14 = vector.load %arg9[%c0_11, %c0_12] : memref<16x32xf32, #tpu.memory_space<vmem>>, vector<16x32xf32>
      tpu.vector_store %arg9[%c0_11, %c0_12], %13 {strides = array<i32>} : memref<16x32xf32, #tpu.memory_space<vmem>>, vector<16x32xf32>,
    } else {
    }
    %c0 = arith.constant 0 : index
    %c0_1 = arith.constant 0 : index
    %3 = vector.load %arg9[%c0, %c0_1] : memref<16x32xf32, #tpu.memory_space<vmem>>, vector<16x32xf32>
    %c0_2 = arith.constant 0 : index
    %c0_3 = arith.constant 0 : index
    %4 = vector.load %arg2[%c0_2, %c0_3] : memref<16x32xf32, #tpu.memory_space<vmem>>, vector<16x32xf32>
    %5 = arith.truncf %4 : vector<16x32xf32> to vector<16x32xbf16>
    %c0_4 = arith.constant 0 : index
    %c0_5 = arith.constant 0 : index
    %6 = vector.load %arg3[%c0_4, %c0_5] : memref<32x32xbf16, #tpu.memory_space<vmem>>, vector<32x32xbf16>
    %cst = arith.constant dense<0.000000e+00> : vector<16x32xf32>
    %7 = tpu.matmul %5, %6, %cst {dimension_numbers = #tpu.dot_dimension_numbers<[1], [0], [0], [1], [0, 0, 1, 1], [], []>} : vector<16x32xbf16>, vector<32x32xbf16>, vector<16x32xf32> -> vector<16x32xf32>
    %8 = arith.addf %3, %7 : vector<16x32xf32>
    %c0_6 = arith.constant 0 : index
    %c0_7 = arith.constant 0 : index
    %9 = vector.load %arg9[%c0_6, %c0_7] : memref<16x32xf32, #tpu.memory_space<vmem>>, vector<16x32xf32>
    tpu.vector_store %arg9[%c0_6, %c0_7], %8 {strides = array<i32>} : memref<16x32xf32, #tpu.memory_space<vmem>>, vector<16x32xf32>,
    %c0_i32_8 = arith.constant 0 : i32
    %10 = arith.cmpi eq, %arg1, %c0_i32_8 : i32
    %11 = arith.extui %10 : i1 to i32
    %c0_i32_9 = arith.constant 0 : i32
    %12 = arith.cmpi ne, %11, %c0_i32_9 : i32
    scf.if %12 {
      %c0_10 = arith.constant 0 : index
      %c0_11 = arith.constant 0 : index
      %13 = vector.load %arg9[%c0_10, %c0_11] : memref<16x32xf32, #tpu.memory_space<vmem>>, vector<16x32xf32>
      %c0_12 = arith.constant 0 : index
      %c0_13 = arith.constant 0 : index
      %14 = vector.load %arg4[%c0_12, %c0_13] : memref<1x32xf32, #tpu.memory_space<vmem>>, vector<1x32xf32>
      %15 = vector.broadcast %14 : vector<1x32xf32> to vector<16x32xf32>
      %16 = arith.addf %13, %15 : vector<16x32xf32>
      %c0_14 = arith.constant 0 : index
      %c0_15 = arith.constant 0 : index
      %17 = vector.load %arg5[%c0_14, %c0_15] : memref<16x32xf32, #tpu.memory_space<vmem>>, vector<16x32xf32>
      %18 = arith.addf %16, %17 : vector<16x32xf32>
      %cst_16 = arith.constant dense<0.000000e+00> : vector<16xf32>
      %19 = vector.multi_reduction <add>, %18, %cst_16 [1] : vector<16x32xf32> to vector<16xf32>
      %20 = vector.shape_cast %19 : vector<16xf32> to vector<16x1xf32>
      %cst_17 = arith.constant 3.200000e+01 : f32
      %21 = vector.broadcast %cst_17 : f32 to vector<16x1xf32>
      %22 = arith.divf %20, %21 : vector<16x1xf32>
      %23 = vector.broadcast %22 : vector<16x1xf32> to vector<16x32xf32>
      %24 = arith.subf %18, %23 : vector<16x32xf32>
      %25 = arith.mulf %24, %24 : vector<16x32xf32>
      %cst_18 = arith.constant dense<0.000000e+00> : vector<16xf32>
      %26 = vector.multi_reduction <add>, %25, %cst_18 [1] : vector<16x32xf32> to vector<16xf32>
      %27 = vector.shape_cast %26 : vector<16xf32> to vector<16x1xf32>
      %cst_19 = arith.constant 3.200000e+01 : f32
      %28 = vector.broadcast %cst_19 : f32 to vector<16x1xf32>
      %29 = arith.divf %27, %28 : vector<16x1xf32>
      %30 = vector.broadcast %22 : vector<16x1xf32> to vector<16x32xf32>
      %31 = arith.subf %18, %30 : vector<16x32xf32>
      %cst_20 = arith.constant 9.99999974E-6 : f32
      %32 = vector.broadcast %cst_20 : f32 to vector<16x1xf32>
      %33 = arith.addf %29, %32 : vector<16x1xf32>
      %34 = math.rsqrt %33 : vector<16x1xf32>
      %35 = vector.broadcast %34 : vector<16x1xf32> to vector<16x32xf32>
      %36 = arith.mulf %31, %35 : vector<16x32xf32>
      %c0_21 = arith.constant 0 : index
      %c0_22 = arith.constant 0 : index
      %37 = vector.load %arg6[%c0_21, %c0_22] : memref<1x32xf32, #tpu.memory_space<vmem>>, vector<1x32xf32>
      %38 = vector.broadcast %37 : vector<1x32xf32> to vector<16x32xf32>
      %39 = arith.mulf %36, %38 : vector<16x32xf32>
      %c0_23 = arith.constant 0 : index
      %c0_24 = arith.constant 0 : index
      %40 = vector.load %arg7[%c0_23, %c0_24] : memref<1x32xf32, #tpu.memory_space<vmem>>, vector<1x32xf32>
      %41 = vector.broadcast %40 : vector<1x32xf32> to vector<16x32xf32>
      %42 = arith.addf %39, %41 : vector<16x32xf32>
      %c0_25 = arith.constant 0 : index
      %c0_26 = arith.constant 0 : index
      %43 = vector.load %arg8[%c0_25, %c0_26] : memref<16x32xf32, #tpu.memory_space<vmem>>, vector<16x32xf32>
      tpu.vector_store %arg8[%c0_25, %c0_26], %42 {strides = array<i32>} : memref<16x32xf32, #tpu.memory_space<vmem>>, vector<16x32xf32>,
    } else {
    }
    return
  }
  func.func @transform_0(%arg0: i32, %arg1: i32) -> (i32, i32) {
    %c0_i32 = arith.constant 0 : i32
    return %arg0, %arg1 : i32, i32
  }
  func.func @transform_1(%arg0: i32, %arg1: i32) -> (i32, i32) {
    %c0_i32 = arith.constant 0 : i32
    %c0_i32_0 = arith.constant 0 : i32
    return %arg1, %c0_i32 : i32, i32
  }
  func.func @transform_2(%arg0: i32, %arg1: i32) -> (i32, i32) {
    %c0_i32 = arith.constant 0 : i32
    %c0_i32_0 = arith.constant 0 : i32
    %c0_i32_1 = arith.constant 0 : i32
    return %c0_i32, %c0_i32_0 : i32, i32
  }
  func.func @transform_3(%arg0: i32, %arg1: i32) -> (i32, i32) {
    %c0_i32 = arith.constant 0 : i32
    %c0_i32_0 = arith.constant 0 : i32
    return %arg0, %c0_i32 : i32, i32
  }
  func.func @transform_4(%arg0: i32, %arg1: i32) -> (i32, i32) {
    %c0_i32 = arith.constant 0 : i32
    %c0_i32_0 = arith.constant 0 : i32
    %c0_i32_1 = arith.constant 0 : i32
    return %c0_i32, %c0_i32_0 : i32, i32
  }
  func.func @transform_5(%arg0: i32, %arg1: i32) -> (i32, i32) {
    %c0_i32 = arith.constant 0 : i32
    %c0_i32_0 = arith.constant 0 : i32
    %c0_i32_1 = arith.constant 0 : i32
    return %c0_i32, %c0_i32_0 : i32, i32
  }
  func.func @transform_6(%arg0: i32, %arg1: i32) -> (i32, i32) {
    %c0_i32 = arith.constant 0 : i32
    %c0_i32_0 = arith.constant 0 : i32
    return %arg0, %c0_i32 : i32, i32
  }
}

module attributes {stable_mosaic.version = 11 : i64} {
  func.func @_matmul_bias_kernel(%arg0: i32, %arg1: i32, %arg2: i32, %arg3: memref<16x32xf32, #tpu.memory_space<vmem>>, %arg4: memref<32x32xbf16, #tpu.memory_space<vmem>>, %arg5: memref<1x32xf32, #tpu.memory_space<vmem>>, %arg6: memref<16x32xf32, #tpu.memory_space<vmem>>, %arg7: memref<16x32xf32, #tpu.memory_space<vmem>>) attributes {dimension_semantics = [#tpu.dimension_semantics<parallel>, #tpu.dimension_semantics<parallel>, #tpu.dimension_semantics<arbitrary>], iteration_bounds = array<i64: 1, 1, 1>, scalar_prefetch = 0 : i64, scratch_operands = 1 : i64, tpu.core_type = #tpu.core_type<tc>, window_params = [{transform_indices = @transform_0, window_bounds = array<i64: 16, 32>}, {transform_indices = @transform_1, window_bounds = array<i64: 32, 32>}, {transform_indices = @transform_2, window_bounds = array<i64: 1, 32>}, {transform_indices = @transform_3, window_bounds = array<i64: 16, 32>}]} {
    %c0_i32 = arith.constant 0 : i32
    %0 = arith.cmpi eq, %arg2, %c0_i32 : i32
    %1 = arith.extui %0 : i1 to i32
    %c0_i32_0 = arith.constant 0 : i32
    %2 = arith.cmpi ne, %1, %c0_i32_0 : i32
    scf.if %2 {
      %cst_10 = arith.constant 0.000000e+00 : f32
      %13 = vector.broadcast %cst_10 : f32 to vector<16x32xf32>
      %c0_11 = arith.constant 0 : index
      %c0_12 = arith.constant 0 : index
      %14 = vector.load %arg7[%c0_11, %c0_12] : memref<16x32xf32, #tpu.memory_space<vmem>>, vector<16x32xf32>
      tpu.vector_store %arg7[%c0_11, %c0_12], %13 {strides = array<i32>} : memref<16x32xf32, #tpu.memory_space<vmem>>, vector<16x32xf32>,
    } else {
    }
    %c0 = arith.constant 0 : index
    %c0_1 = arith.constant 0 : index
    %3 = vector.load %arg7[%c0, %c0_1] : memref<16x32xf32, #tpu.memory_space<vmem>>, vector<16x32xf32>
    %c0_2 = arith.constant 0 : index
    %c0_3 = arith.constant 0 : index
    %4 = vector.load %arg3[%c0_2, %c0_3] : memref<16x32xf32, #tpu.memory_space<vmem>>, vector<16x32xf32>
    %5 = arith.truncf %4 : vector<16x32xf32> to vector<16x32xbf16>
    %c0_4 = arith.constant 0 : index
    %c0_5 = arith.constant 0 : index
    %6 = vector.load %arg4[%c0_4, %c0_5] : memref<32x32xbf16, #tpu.memory_space<vmem>>, vector<32x32xbf16>
    %cst = arith.constant dense<0.000000e+00> : vector<16x32xf32>
    %7 = tpu.matmul %5, %6, %cst {dimension_numbers = #tpu.dot_dimension_numbers<[1], [0], [0], [1], [0, 0, 1, 1], [], []>} : vector<16x32xbf16>, vector<32x32xbf16>, vector<16x32xf32> -> vector<16x32xf32>
    %8 = arith.addf %3, %7 : vector<16x32xf32>
    %c0_6 = arith.constant 0 : index
    %c0_7 = arith.constant 0 : index
    %9 = vector.load %arg7[%c0_6, %c0_7] : memref<16x32xf32, #tpu.memory_space<vmem>>, vector<16x32xf32>
    tpu.vector_store %arg7[%c0_6, %c0_7], %8 {strides = array<i32>} : memref<16x32xf32, #tpu.memory_space<vmem>>, vector<16x32xf32>,
    %c0_i32_8 = arith.constant 0 : i32
    %10 = arith.cmpi eq, %arg2, %c0_i32_8 : i32
    %11 = arith.extui %10 : i1 to i32
    %c0_i32_9 = arith.constant 0 : i32
    %12 = arith.cmpi ne, %11, %c0_i32_9 : i32
    scf.if %12 {
      %c0_10 = arith.constant 0 : index
      %c0_11 = arith.constant 0 : index
      %13 = vector.load %arg7[%c0_10, %c0_11] : memref<16x32xf32, #tpu.memory_space<vmem>>, vector<16x32xf32>
      %c0_12 = arith.constant 0 : index
      %c0_13 = arith.constant 0 : index
      %14 = vector.load %arg5[%c0_12, %c0_13] : memref<1x32xf32, #tpu.memory_space<vmem>>, vector<1x32xf32>
      %15 = vector.broadcast %14 : vector<1x32xf32> to vector<16x32xf32>
      %16 = arith.addf %13, %15 : vector<16x32xf32>
      %c0_14 = arith.constant 0 : index
      %c0_15 = arith.constant 0 : index
      %17 = vector.load %arg6[%c0_14, %c0_15] : memref<16x32xf32, #tpu.memory_space<vmem>>, vector<16x32xf32>
      tpu.vector_store %arg6[%c0_14, %c0_15], %16 {strides = array<i32>} : memref<16x32xf32, #tpu.memory_space<vmem>>, vector<16x32xf32>,
    } else {
    }
    return
  }
  func.func @transform_0(%arg0: i32, %arg1: i32, %arg2: i32) -> (i32, i32) {
    %c0_i32 = arith.constant 0 : i32
    return %arg0, %arg2 : i32, i32
  }
  func.func @transform_1(%arg0: i32, %arg1: i32, %arg2: i32) -> (i32, i32) {
    %c0_i32 = arith.constant 0 : i32
    return %arg2, %arg1 : i32, i32
  }
  func.func @transform_2(%arg0: i32, %arg1: i32, %arg2: i32) -> (i32, i32) {
    %c0_i32 = arith.constant 0 : i32
    %c0_i32_0 = arith.constant 0 : i32
    return %c0_i32, %arg1 : i32, i32
  }
  func.func @transform_3(%arg0: i32, %arg1: i32, %arg2: i32) -> (i32, i32) {
    %c0_i32 = arith.constant 0 : i32
    return %arg0, %arg1 : i32, i32
  }
}

module attributes {stable_mosaic.version = 11 : i64} {
  func.func @_matmul_bias_kernel(%arg0: i32, %arg1: i32, %arg2: i32, %arg3: memref<24x32xf32, #tpu.memory_space<vmem>>, %arg4: memref<32x64xbf16, #tpu.memory_space<vmem>>, %arg5: memref<1x64xf32, #tpu.memory_space<vmem>>, %arg6: memref<24x64xf32, #tpu.memory_space<vmem>>, %arg7: memref<24x64xf32, #tpu.memory_space<vmem>>) attributes {dimension_semantics = [#tpu.dimension_semantics<parallel>, #tpu.dimension_semantics<parallel>, #tpu.dimension_semantics<arbitrary>], iteration_bounds = array<i64: 1, 1, 1>, scalar_prefetch = 0 : i64, scratch_operands = 1 : i64, tpu.core_type = #tpu.core_type<tc>, window_params = [{transform_indices = @transform_0, window_bounds = array<i64: 24, 32>}, {transform_indices = @transform_1, window_bounds = array<i64: 32, 64>}, {transform_indices = @transform_2, window_bounds = array<i64: 1, 64>}, {transform_indices = @transform_3, window_bounds = array<i64: 24, 64>}]} {
    %c0_i32 = arith.constant 0 : i32
    %0 = arith.cmpi eq, %arg2, %c0_i32 : i32
    %1 = arith.extui %0 : i1 to i32
    %c0_i32_0 = arith.constant 0 : i32
    %2 = arith.cmpi ne, %1, %c0_i32_0 : i32
    scf.if %2 {
      %cst_10 = arith.constant 0.000000e+00 : f32
      %13 = vector.broadcast %cst_10 : f32 to vector<24x64xf32>
      %c0_11 = arith.constant 0 : index
      %c0_12 = arith.constant 0 : index
      %14 = vector.load %arg7[%c0_11, %c0_12] : memref<24x64xf32, #tpu.memory_space<vmem>>, vector<24x64xf32>
      tpu.vector_store %arg7[%c0_11, %c0_12], %13 {strides = array<i32>} : memref<24x64xf32, #tpu.memory_space<vmem>>, vector<24x64xf32>,
    } else {
    }
    %c0 = arith.constant 0 : index
    %c0_1 = arith.constant 0 : index
    %3 = vector.load %arg7[%c0, %c0_1] : memref<24x64xf32, #tpu.memory_space<vmem>>, vector<24x64xf32>
    %c0_2 = arith.constant 0 : index
    %c0_3 = arith.constant 0 : index
    %4 = vector.load %arg3[%c0_2, %c0_3] : memref<24x32xf32, #tpu.memory_space<vmem>>, vector<24x32xf32>
    %5 = arith.truncf %4 : vector<24x32xf32> to vector<24x32xbf16>
    %c0_4 = arith.constant 0 : index
    %c0_5 = arith.constant 0 : index
    %6 = vector.load %arg4[%c0_4, %c0_5] : memref<32x64xbf16, #tpu.memory_space<vmem>>, vector<32x64xbf16>
    %cst = arith.constant dense<0.000000e+00> : vector<24x64xf32>
    %7 = tpu.matmul %5, %6, %cst {dimension_numbers = #tpu.dot_dimension_numbers<[1], [0], [0], [1], [0, 0, 1, 1], [], []>} : vector<24x32xbf16>, vector<32x64xbf16>, vector<24x64xf32> -> vector<24x64xf32>
    %8 = arith.addf %3, %7 : vector<24x64xf32>
    %c0_6 = arith.constant 0 : index
    %c0_7 = arith.constant 0 : index
    %9 = vector.load %arg7[%c0_6, %c0_7] : memref<24x64xf32, #tpu.memory_space<vmem>>, vector<24x64xf32>
    tpu.vector_store %arg7[%c0_6, %c0_7], %8 {strides = array<i32>} : memref<24x64xf32, #tpu.memory_space<vmem>>, vector<24x64xf32>,
    %c0_i32_8 = arith.constant 0 : i32
    %10 = arith.cmpi eq, %arg2, %c0_i32_8 : i32
    %11 = arith.extui %10 : i1 to i32
    %c0_i32_9 = arith.constant 0 : i32
    %12 = arith.cmpi ne, %11, %c0_i32_9 : i32
    scf.if %12 {
      %c0_10 = arith.constant 0 : index
      %c0_11 = arith.constant 0 : index
      %13 = vector.load %arg7[%c0_10, %c0_11] : memref<24x64xf32, #tpu.memory_space<vmem>>, vector<24x64xf32>
      %c0_12 = arith.constant 0 : index
      %c0_13 = arith.constant 0 : index
      %14 = vector.load %arg5[%c0_12, %c0_13] : memref<1x64xf32, #tpu.memory_space<vmem>>, vector<1x64xf32>
      %15 = vector.broadcast %14 : vector<1x64xf32> to vector<24x64xf32>
      %16 = arith.addf %13, %15 : vector<24x64xf32>
      %c0_14 = arith.constant 0 : index
      %c0_15 = arith.constant 0 : index
      %17 = vector.load %arg6[%c0_14, %c0_15] : memref<24x64xf32, #tpu.memory_space<vmem>>, vector<24x64xf32>
      tpu.vector_store %arg6[%c0_14, %c0_15], %16 {strides = array<i32>} : memref<24x64xf32, #tpu.memory_space<vmem>>, vector<24x64xf32>,
    } else {
    }
    return
  }
  func.func @transform_0(%arg0: i32, %arg1: i32, %arg2: i32) -> (i32, i32) {
    %c0_i32 = arith.constant 0 : i32
    return %arg0, %arg2 : i32, i32
  }
  func.func @transform_1(%arg0: i32, %arg1: i32, %arg2: i32) -> (i32, i32) {
    %c0_i32 = arith.constant 0 : i32
    return %arg2, %arg1 : i32, i32
  }
  func.func @transform_2(%arg0: i32, %arg1: i32, %arg2: i32) -> (i32, i32) {
    %c0_i32 = arith.constant 0 : i32
    %c0_i32_0 = arith.constant 0 : i32
    return %c0_i32, %arg1 : i32, i32
  }
  func.func @transform_3(%arg0: i32, %arg1: i32, %arg2: i32) -> (i32, i32) {
    %c0_i32 = arith.constant 0 : i32
    return %arg0, %arg1 : i32, i32
  }
}

module attributes {stable_mosaic.version = 11 : i64} {
  func.func @_matmul_res_ln_kernel(%arg0: i32, %arg1: i32, %arg2: memref<16x64xf32, #tpu.memory_space<vmem>>, %arg3: memref<64x32xbf16, #tpu.memory_space<vmem>>, %arg4: memref<1x32xf32, #tpu.memory_space<vmem>>, %arg5: memref<16x32xf32, #tpu.memory_space<vmem>>, %arg6: memref<1x32xf32, #tpu.memory_space<vmem>>, %arg7: memref<1x32xf32, #tpu.memory_space<vmem>>, %arg8: memref<16x32xf32, #tpu.memory_space<vmem>>, %arg9: memref<16x32xf32, #tpu.memory_space<vmem>>) attributes {dimension_semantics = [#tpu.dimension_semantics<parallel>, #tpu.dimension_semantics<arbitrary>], iteration_bounds = array<i64: 1, 1>, scalar_prefetch = 0 : i64, scratch_operands = 1 : i64, tpu.core_type = #tpu.core_type<tc>, window_params = [{transform_indices = @transform_0, window_bounds = array<i64: 16, 64>}, {transform_indices = @transform_1, window_bounds = array<i64: 64, 32>}, {pipeline_mode = #tpu.pipeline_mode<synchronous>, transform_indices = @transform_2, window_bounds = array<i64: 1, 32>}, {transform_indices = @transform_3, window_bounds = array<i64: 16, 32>}, {pipeline_mode = #tpu.pipeline_mode<synchronous>, transform_indices = @transform_4, window_bounds = array<i64: 1, 32>}, {pipeline_mode = #tpu.pipeline_mode<synchronous>, transform_indices = @transform_5, window_bounds = array<i64: 1, 32>}, {transform_indices = @transform_6, window_bounds = array<i64: 16, 32>}]} {
    %c0_i32 = arith.constant 0 : i32
    %0 = arith.cmpi eq, %arg1, %c0_i32 : i32
    %1 = arith.extui %0 : i1 to i32
    %c0_i32_0 = arith.constant 0 : i32
    %2 = arith.cmpi ne, %1, %c0_i32_0 : i32
    scf.if %2 {
      %cst_10 = arith.constant 0.000000e+00 : f32
      %13 = vector.broadcast %cst_10 : f32 to vector<16x32xf32>
      %c0_11 = arith.constant 0 : index
      %c0_12 = arith.constant 0 : index
      %14 = vector.load %arg9[%c0_11, %c0_12] : memref<16x32xf32, #tpu.memory_space<vmem>>, vector<16x32xf32>
      tpu.vector_store %arg9[%c0_11, %c0_12], %13 {strides = array<i32>} : memref<16x32xf32, #tpu.memory_space<vmem>>, vector<16x32xf32>,
    } else {
    }
    %c0 = arith.constant 0 : index
    %c0_1 = arith.constant 0 : index
    %3 = vector.load %arg9[%c0, %c0_1] : memref<16x32xf32, #tpu.memory_space<vmem>>, vector<16x32xf32>
    %c0_2 = arith.constant 0 : index
    %c0_3 = arith.constant 0 : index
    %4 = vector.load %arg2[%c0_2, %c0_3] : memref<16x64xf32, #tpu.memory_space<vmem>>, vector<16x64xf32>
    %5 = arith.truncf %4 : vector<16x64xf32> to vector<16x64xbf16>
    %c0_4 = arith.constant 0 : index
    %c0_5 = arith.constant 0 : index
    %6 = vector.load %arg3[%c0_4, %c0_5] : memref<64x32xbf16, #tpu.memory_space<vmem>>, vector<64x32xbf16>
    %cst = arith.constant dense<0.000000e+00> : vector<16x32xf32>
    %7 = tpu.matmul %5, %6, %cst {dimension_numbers = #tpu.dot_dimension_numbers<[1], [0], [0], [1], [0, 0, 1, 1], [], []>} : vector<16x64xbf16>, vector<64x32xbf16>, vector<16x32xf32> -> vector<16x32xf32>
    %8 = arith.addf %3, %7 : vector<16x32xf32>
    %c0_6 = arith.constant 0 : index
    %c0_7 = arith.constant 0 : index
    %9 = vector.load %arg9[%c0_6, %c0_7] : memref<16x32xf32, #tpu.memory_space<vmem>>, vector<16x32xf32>
    tpu.vector_store %arg9[%c0_6, %c0_7], %8 {strides = array<i32>} : memref<16x32xf32, #tpu.memory_space<vmem>>, vector<16x32xf32>,
    %c0_i32_8 = arith.constant 0 : i32
    %10 = arith.cmpi eq, %arg1, %c0_i32_8 : i32
    %11 = arith.extui %10 : i1 to i32
    %c0_i32_9 = arith.constant 0 : i32
    %12 = arith.cmpi ne, %11, %c0_i32_9 : i32
    scf.if %12 {
      %c0_10 = arith.constant 0 : index
      %c0_11 = arith.constant 0 : index
      %13 = vector.load %arg9[%c0_10, %c0_11] : memref<16x32xf32, #tpu.memory_space<vmem>>, vector<16x32xf32>
      %c0_12 = arith.constant 0 : index
      %c0_13 = arith.constant 0 : index
      %14 = vector.load %arg4[%c0_12, %c0_13] : memref<1x32xf32, #tpu.memory_space<vmem>>, vector<1x32xf32>
      %15 = vector.broadcast %14 : vector<1x32xf32> to vector<16x32xf32>
      %16 = arith.addf %13, %15 : vector<16x32xf32>
      %c0_14 = arith.constant 0 : index
      %c0_15 = arith.constant 0 : index
      %17 = vector.load %arg5[%c0_14, %c0_15] : memref<16x32xf32, #tpu.memory_space<vmem>>, vector<16x32xf32>
      %18 = arith.addf %16, %17 : vector<16x32xf32>
      %cst_16 = arith.constant dense<0.000000e+00> : vector<16xf32>
      %19 = vector.multi_reduction <add>, %18, %cst_16 [1] : vector<16x32xf32> to vector<16xf32>
      %20 = vector.shape_cast %19 : vector<16xf32> to vector<16x1xf32>
      %cst_17 = arith.constant 3.200000e+01 : f32
      %21 = vector.broadcast %cst_17 : f32 to vector<16x1xf32>
      %22 = arith.divf %20, %21 : vector<16x1xf32>
      %23 = vector.broadcast %22 : vector<16x1xf32> to vector<16x32xf32>
      %24 = arith.subf %18, %23 : vector<16x32xf32>
      %25 = arith.mulf %24, %24 : vector<16x32xf32>
      %cst_18 = arith.constant dense<0.000000e+00> : vector<16xf32>
      %26 = vector.multi_reduction <add>, %25, %cst_18 [1] : vector<16x32xf32> to vector<16xf32>
      %27 = vector.shape_cast %26 : vector<16xf32> to vector<16x1xf32>
      %cst_19 = arith.constant 3.200000e+01 : f32
      %28 = vector.broadcast %cst_19 : f32 to vector<16x1xf32>
      %29 = arith.divf %27, %28 : vector<16x1xf32>
      %30 = vector.broadcast %22 : vector<16x1xf32> to vector<16x32xf32>
      %31 = arith.subf %18, %30 : vector<16x32xf32>
      %cst_20 = arith.constant 9.99999974E-6 : f32
      %32 = vector.broadcast %cst_20 : f32 to vector<16x1xf32>
      %33 = arith.addf %29, %32 : vector<16x1xf32>
      %34 = math.rsqrt %33 : vector<16x1xf32>
      %35 = vector.broadcast %34 : vector<16x1xf32> to vector<16x32xf32>
      %36 = arith.mulf %31, %35 : vector<16x32xf32>
      %c0_21 = arith.constant 0 : index
      %c0_22 = arith.constant 0 : index
      %37 = vector.load %arg6[%c0_21, %c0_22] : memref<1x32xf32, #tpu.memory_space<vmem>>, vector<1x32xf32>
      %38 = vector.broadcast %37 : vector<1x32xf32> to vector<16x32xf32>
      %39 = arith.mulf %36, %38 : vector<16x32xf32>
      %c0_23 = arith.constant 0 : index
      %c0_24 = arith.constant 0 : index
      %40 = vector.load %arg7[%c0_23, %c0_24] : memref<1x32xf32, #tpu.memory_space<vmem>>, vector<1x32xf32>
      %41 = vector.broadcast %40 : vector<1x32xf32> to vector<16x32xf32>
      %42 = arith.addf %39, %41 : vector<16x32xf32>
      %c0_25 = arith.constant 0 : index
      %c0_26 = arith.constant 0 : index
      %43 = vector.load %arg8[%c0_25, %c0_26] : memref<16x32xf32, #tpu.memory_space<vmem>>, vector<16x32xf32>
      tpu.vector_store %arg8[%c0_25, %c0_26], %42 {strides = array<i32>} : memref<16x32xf32, #tpu.memory_space<vmem>>, vector<16x32xf32>,
    } else {
    }
    return
  }
  func.func @transform_0(%arg0: i32, %arg1: i32) -> (i32, i32) {
    %c0_i32 = arith.constant 0 : i32
    return %arg0, %arg1 : i32, i32
  }
  func.func @transform_1(%arg0: i32, %arg1: i32) -> (i32, i32) {
    %c0_i32 = arith.constant 0 : i32
    %c0_i32_0 = arith.constant 0 : i32
    return %arg1, %c0_i32 : i32, i32
  }
  func.func @transform_2(%arg0: i32, %arg1: i32) -> (i32, i32) {
    %c0_i32 = arith.constant 0 : i32
    %c0_i32_0 = arith.constant 0 : i32
    %c0_i32_1 = arith.constant 0 : i32
    return %c0_i32, %c0_i32_0 : i32, i32
  }
  func.func @transform_3(%arg0: i32, %arg1: i32) -> (i32, i32) {
    %c0_i32 = arith.constant 0 : i32
    %c0_i32_0 = arith.constant 0 : i32
    return %arg0, %c0_i32 : i32, i32
  }
  func.func @transform_4(%arg0: i32, %arg1: i32) -> (i32, i32) {
    %c0_i32 = arith.constant 0 : i32
    %c0_i32_0 = arith.constant 0 : i32
    %c0_i32_1 = arith.constant 0 : i32
    return %c0_i32, %c0_i32_0 : i32, i32
  }
  func.func @transform_5(%arg0: i32, %arg1: i32) -> (i32, i32) {
    %c0_i32 = arith.constant 0 : i32
    %c0_i32_0 = arith.constant 0 : i32
    %c0_i32_1 = arith.constant 0 : i32
    return %c0_i32, %c0_i32_0 : i32, i32
  }
  func.func @transform_6(%arg0: i32, %arg1: i32) -> (i32, i32) {
    %c0_i32 = arith.constant 0 : i32
    %c0_i32_0 = arith.constant 0 : i32
    return %arg0, %c0_i32 : i32, i32
  }
}

module attributes {stable_mosaic.version = 11 : i64} {
  func.func @_matmul_res_ln_kernel(%arg0: i32, %arg1: i32, %arg2: memref<16x64xf32, #tpu.memory_space<vmem>>, %arg3: memref<64x32xbf16, #tpu.memory_space<vmem>>, %arg4: memref<1x32xf32, #tpu.memory_space<vmem>>, %arg5: memref<16x32xf32, #tpu.memory_space<vmem>>, %arg6: memref<1x32xf32, #tpu.memory_space<vmem>>, %arg7: memref<1x32xf32, #tpu.memory_space<vmem>>, %arg8: memref<16x32xf32, #tpu.memory_space<vmem>>, %arg9: memref<16x32xf32, #tpu.memory_space<vmem>>) attributes {dimension_semantics = [#tpu.dimension_semantics<parallel>, #tpu.dimension_semantics<arbitrary>], iteration_bounds = array<i64: 1, 1>, scalar_prefetch = 0 : i64, scratch_operands = 1 : i64, tpu.core_type = #tpu.core_type<tc>, window_params = [{transform_indices = @transform_0, window_bounds = array<i64: 16, 64>}, {transform_indices = @transform_1, window_bounds = array<i64: 64, 32>}, {pipeline_mode = #tpu.pipeline_mode<synchronous>, transform_indices = @transform_2, window_bounds = array<i64: 1, 32>}, {transform_indices = @transform_3, window_bounds = array<i64: 16, 32>}, {pipeline_mode = #tpu.pipeline_mode<synchronous>, transform_indices = @transform_4, window_bounds = array<i64: 1, 32>}, {pipeline_mode = #tpu.pipeline_mode<synchronous>, transform_indices = @transform_5, window_bounds = array<i64: 1, 32>}, {transform_indices = @transform_6, window_bounds = array<i64: 16, 32>}]} {
    %c0_i32 = arith.constant 0 : i32
    %0 = arith.cmpi eq, %arg1, %c0_i32 : i32
    %1 = arith.extui %0 : i1 to i32
    %c0_i32_0 = arith.constant 0 : i32
    %2 = arith.cmpi ne, %1, %c0_i32_0 : i32
    scf.if %2 {
      %cst_10 = arith.constant 0.000000e+00 : f32
      %13 = vector.broadcast %cst_10 : f32 to vector<16x32xf32>
      %c0_11 = arith.constant 0 : index
      %c0_12 = arith.constant 0 : index
      %14 = vector.load %arg9[%c0_11, %c0_12] : memref<16x32xf32, #tpu.memory_space<vmem>>, vector<16x32xf32>
      tpu.vector_store %arg9[%c0_11, %c0_12], %13 {strides = array<i32>} : memref<16x32xf32, #tpu.memory_space<vmem>>, vector<16x32xf32>,
    } else {
    }
    %c0 = arith.constant 0 : index
    %c0_1 = arith.constant 0 : index
    %3 = vector.load %arg9[%c0, %c0_1] : memref<16x32xf32, #tpu.memory_space<vmem>>, vector<16x32xf32>
    %c0_2 = arith.constant 0 : index
    %c0_3 = arith.constant 0 : index
    %4 = vector.load %arg2[%c0_2, %c0_3] : memref<16x64xf32, #tpu.memory_space<vmem>>, vector<16x64xf32>
    %5 = arith.truncf %4 : vector<16x64xf32> to vector<16x64xbf16>
    %c0_4 = arith.constant 0 : index
    %c0_5 = arith.constant 0 : index
    %6 = vector.load %arg3[%c0_4, %c0_5] : memref<64x32xbf16, #tpu.memory_space<vmem>>, vector<64x32xbf16>
    %cst = arith.constant dense<0.000000e+00> : vector<16x32xf32>
    %7 = tpu.matmul %5, %6, %cst {dimension_numbers = #tpu.dot_dimension_numbers<[1], [0], [0], [1], [0, 0, 1, 1], [], []>} : vector<16x64xbf16>, vector<64x32xbf16>, vector<16x32xf32> -> vector<16x32xf32>
    %8 = arith.addf %3, %7 : vector<16x32xf32>
    %c0_6 = arith.constant 0 : index
    %c0_7 = arith.constant 0 : index
    %9 = vector.load %arg9[%c0_6, %c0_7] : memref<16x32xf32, #tpu.memory_space<vmem>>, vector<16x32xf32>
    tpu.vector_store %arg9[%c0_6, %c0_7], %8 {strides = array<i32>} : memref<16x32xf32, #tpu.memory_space<vmem>>, vector<16x32xf32>,
    %c0_i32_8 = arith.constant 0 : i32
    %10 = arith.cmpi eq, %arg1, %c0_i32_8 : i32
    %11 = arith.extui %10 : i1 to i32
    %c0_i32_9 = arith.constant 0 : i32
    %12 = arith.cmpi ne, %11, %c0_i32_9 : i32
    scf.if %12 {
      %c0_10 = arith.constant 0 : index
      %c0_11 = arith.constant 0 : index
      %13 = vector.load %arg9[%c0_10, %c0_11] : memref<16x32xf32, #tpu.memory_space<vmem>>, vector<16x32xf32>
      %c0_12 = arith.constant 0 : index
      %c0_13 = arith.constant 0 : index
      %14 = vector.load %arg4[%c0_12, %c0_13] : memref<1x32xf32, #tpu.memory_space<vmem>>, vector<1x32xf32>
      %15 = vector.broadcast %14 : vector<1x32xf32> to vector<16x32xf32>
      %16 = arith.addf %13, %15 : vector<16x32xf32>
      %c0_14 = arith.constant 0 : index
      %c0_15 = arith.constant 0 : index
      %17 = vector.load %arg5[%c0_14, %c0_15] : memref<16x32xf32, #tpu.memory_space<vmem>>, vector<16x32xf32>
      %18 = arith.addf %16, %17 : vector<16x32xf32>
      %cst_16 = arith.constant dense<0.000000e+00> : vector<16xf32>
      %19 = vector.multi_reduction <add>, %18, %cst_16 [1] : vector<16x32xf32> to vector<16xf32>
      %20 = vector.shape_cast %19 : vector<16xf32> to vector<16x1xf32>
      %cst_17 = arith.constant 3.200000e+01 : f32
      %21 = vector.broadcast %cst_17 : f32 to vector<16x1xf32>
      %22 = arith.divf %20, %21 : vector<16x1xf32>
      %23 = vector.broadcast %22 : vector<16x1xf32> to vector<16x32xf32>
      %24 = arith.subf %18, %23 : vector<16x32xf32>
      %25 = arith.mulf %24, %24 : vector<16x32xf32>
      %cst_18 = arith.constant dense<0.000000e+00> : vector<16xf32>
      %26 = vector.multi_reduction <add>, %25, %cst_18 [1] : vector<16x32xf32> to vector<16xf32>
      %27 = vector.shape_cast %26 : vector<16xf32> to vector<16x1xf32>
      %cst_19 = arith.constant 3.200000e+01 : f32
      %28 = vector.broadcast %cst_19 : f32 to vector<16x1xf32>
      %29 = arith.divf %27, %28 : vector<16x1xf32>
      %30 = vector.broadcast %22 : vector<16x1xf32> to vector<16x32xf32>
      %31 = arith.subf %18, %30 : vector<16x32xf32>
      %cst_20 = arith.constant 9.99999974E-6 : f32
      %32 = vector.broadcast %cst_20 : f32 to vector<16x1xf32>
      %33 = arith.addf %29, %32 : vector<16x1xf32>
      %34 = math.rsqrt %33 : vector<16x1xf32>
      %35 = vector.broadcast %34 : vector<16x1xf32> to vector<16x32xf32>
      %36 = arith.mulf %31, %35 : vector<16x32xf32>
      %c0_21 = arith.constant 0 : index
      %c0_22 = arith.constant 0 : index
      %37 = vector.load %arg6[%c0_21, %c0_22] : memref<1x32xf32, #tpu.memory_space<vmem>>, vector<1x32xf32>
      %38 = vector.broadcast %37 : vector<1x32xf32> to vector<16x32xf32>
      %39 = arith.mulf %36, %38 : vector<16x32xf32>
      %c0_23 = arith.constant 0 : index
      %c0_24 = arith.constant 0 : index
      %40 = vector.load %arg7[%c0_23, %c0_24] : memref<1x32xf32, #tpu.memory_space<vmem>>, vector<1x32xf32>
      %41 = vector.broadcast %40 : vector<1x32xf32> to vector<16x32xf32>
      %42 = arith.addf %39, %41 : vector<16x32xf32>
      %c0_25 = arith.constant 0 : index
      %c0_26 = arith.constant 0 : index
      %43 = vector.load %arg8[%c0_25, %c0_26] : memref<16x32xf32, #tpu.memory_space<vmem>>, vector<16x32xf32>
      tpu.vector_store %arg8[%c0_25, %c0_26], %42 {strides = array<i32>} : memref<16x32xf32, #tpu.memory_space<vmem>>, vector<16x32xf32>,
    } else {
    }
    return
  }
  func.func @transform_0(%arg0: i32, %arg1: i32) -> (i32, i32) {
    %c0_i32 = arith.constant 0 : i32
    return %arg0, %arg1 : i32, i32
  }
  func.func @transform_1(%arg0: i32, %arg1: i32) -> (i32, i32) {
    %c0_i32 = arith.constant 0 : i32
    %c0_i32_0 = arith.constant 0 : i32
    return %arg1, %c0_i32 : i32, i32
  }
  func.func @transform_2(%arg0: i32, %arg1: i32) -> (i32, i32) {
    %c0_i32 = arith.constant 0 : i32
    %c0_i32_0 = arith.constant 0 : i32
    %c0_i32_1 = arith.constant 0 : i32
    return %c0_i32, %c0_i32_0 : i32, i32
  }
  func.func @transform_3(%arg0: i32, %arg1: i32) -> (i32, i32) {
    %c0_i32 = arith.constant 0 : i32
    %c0_i32_0 = arith.constant 0 : i32
    return %arg0, %c0_i32 : i32, i32
  }
  func.func @transform_4(%arg0: i32, %arg1: i32) -> (i32, i32) {
    %c0_i32 = arith.constant 0 : i32
    %c0_i32_0 = arith.constant 0 : i32
    %c0_i32_1 = arith.constant 0 : i32
    return %c0_i32, %c0_i32_0 : i32, i32
  }
  func.func @transform_5(%arg0: i32, %arg1: i32) -> (i32, i32) {
    %c0_i32 = arith.constant 0 : i32
    %c0_i32_0 = arith.constant 0 : i32
    %c0_i32_1 = arith.constant 0 : i32
    return %c0_i32, %c0_i32_0 : i32, i32
  }
  func.func @transform_6(%arg0: i32, %arg1: i32) -> (i32, i32) {
    %c0_i32 = arith.constant 0 : i32
    %c0_i32_0 = arith.constant 0 : i32
    return %arg0, %c0_i32 : i32, i32
  }
}

module attributes {stable_mosaic.version = 11 : i64} {
  func.func @_matmul_bias_kernel(%arg0: i32, %arg1: i32, %arg2: i32, %arg3: memref<16x32xf32, #tpu.memory_space<vmem>>, %arg4: memref<32x64xbf16, #tpu.memory_space<vmem>>, %arg5: memref<1x64xf32, #tpu.memory_space<vmem>>, %arg6: memref<16x64xf32, #tpu.memory_space<vmem>>, %arg7: memref<16x64xf32, #tpu.memory_space<vmem>>) attributes {dimension_semantics = [#tpu.dimension_semantics<parallel>, #tpu.dimension_semantics<parallel>, #tpu.dimension_semantics<arbitrary>], iteration_bounds = array<i64: 1, 1, 1>, scalar_prefetch = 0 : i64, scratch_operands = 1 : i64, tpu.core_type = #tpu.core_type<tc>, window_params = [{transform_indices = @transform_0, window_bounds = array<i64: 16, 32>}, {transform_indices = @transform_1, window_bounds = array<i64: 32, 64>}, {transform_indices = @transform_2, window_bounds = array<i64: 1, 64>}, {transform_indices = @transform_3, window_bounds = array<i64: 16, 64>}]} {
    %c0_i32 = arith.constant 0 : i32
    %0 = arith.cmpi eq, %arg2, %c0_i32 : i32
    %1 = arith.extui %0 : i1 to i32
    %c0_i32_0 = arith.constant 0 : i32
    %2 = arith.cmpi ne, %1, %c0_i32_0 : i32
    scf.if %2 {
      %cst_10 = arith.constant 0.000000e+00 : f32
      %13 = vector.broadcast %cst_10 : f32 to vector<16x64xf32>
      %c0_11 = arith.constant 0 : index
      %c0_12 = arith.constant 0 : index
      %14 = vector.load %arg7[%c0_11, %c0_12] : memref<16x64xf32, #tpu.memory_space<vmem>>, vector<16x64xf32>
      tpu.vector_store %arg7[%c0_11, %c0_12], %13 {strides = array<i32>} : memref<16x64xf32, #tpu.memory_space<vmem>>, vector<16x64xf32>,
    } else {
    }
    %c0 = arith.constant 0 : index
    %c0_1 = arith.constant 0 : index
    %3 = vector.load %arg7[%c0, %c0_1] : memref<16x64xf32, #tpu.memory_space<vmem>>, vector<16x64xf32>
    %c0_2 = arith.constant 0 : index
    %c0_3 = arith.constant 0 : index
    %4 = vector.load %arg3[%c0_2, %c0_3] : memref<16x32xf32, #tpu.memory_space<vmem>>, vector<16x32xf32>
    %5 = arith.truncf %4 : vector<16x32xf32> to vector<16x32xbf16>
    %c0_4 = arith.constant 0 : index
    %c0_5 = arith.constant 0 : index
    %6 = vector.load %arg4[%c0_4, %c0_5] : memref<32x64xbf16, #tpu.memory_space<vmem>>, vector<32x64xbf16>
    %cst = arith.constant dense<0.000000e+00> : vector<16x64xf32>
    %7 = tpu.matmul %5, %6, %cst {dimension_numbers = #tpu.dot_dimension_numbers<[1], [0], [0], [1], [0, 0, 1, 1], [], []>} : vector<16x32xbf16>, vector<32x64xbf16>, vector<16x64xf32> -> vector<16x64xf32>
    %8 = arith.addf %3, %7 : vector<16x64xf32>
    %c0_6 = arith.constant 0 : index
    %c0_7 = arith.constant 0 : index
    %9 = vector.load %arg7[%c0_6, %c0_7] : memref<16x64xf32, #tpu.memory_space<vmem>>, vector<16x64xf32>
    tpu.vector_store %arg7[%c0_6, %c0_7], %8 {strides = array<i32>} : memref<16x64xf32, #tpu.memory_space<vmem>>, vector<16x64xf32>,
    %c0_i32_8 = arith.constant 0 : i32
    %10 = arith.cmpi eq, %arg2, %c0_i32_8 : i32
    %11 = arith.extui %10 : i1 to i32
    %c0_i32_9 = arith.constant 0 : i32
    %12 = arith.cmpi ne, %11, %c0_i32_9 : i32
    scf.if %12 {
      %c0_10 = arith.constant 0 : index
      %c0_11 = arith.constant 0 : index
      %13 = vector.load %arg7[%c0_10, %c0_11] : memref<16x64xf32, #tpu.memory_space<vmem>>, vector<16x64xf32>
      %c0_12 = arith.constant 0 : index
      %c0_13 = arith.constant 0 : index
      %14 = vector.load %arg5[%c0_12, %c0_13] : memref<1x64xf32, #tpu.memory_space<vmem>>, vector<1x64xf32>
      %15 = vector.broadcast %14 : vector<1x64xf32> to vector<16x64xf32>
      %16 = arith.addf %13, %15 : vector<16x64xf32>
      %cst_14 = arith.constant 0.000000e+00 : f32
      %17 = vector.broadcast %cst_14 : f32 to vector<16x64xf32>
      %18 = arith.maximumf %16, %17 : vector<16x64xf32>
      %c0_15 = arith.constant 0 : index
      %c0_16 = arith.constant 0 : index
      %19 = vector.load %arg6[%c0_15, %c0_16] : memref<16x64xf32, #tpu.memory_space<vmem>>, vector<16x64xf32>
      tpu.vector_store %arg6[%c0_15, %c0_16], %18 {strides = array<i32>} : memref<16x64xf32, #tpu.memory_space<vmem>>, vector<16x64xf32>,
    } else {
    }
    return
  }
  func.func @transform_0(%arg0: i32, %arg1: i32, %arg2: i32) -> (i32, i32) {
    %c0_i32 = arith.constant 0 : i32
    return %arg0, %arg2 : i32, i32
  }
  func.func @transform_1(%arg0: i32, %arg1: i32, %arg2: i32) -> (i32, i32) {
    %c0_i32 = arith.constant 0 : i32
    return %arg2, %arg1 : i32, i32
  }
  func.func @transform_2(%arg0: i32, %arg1: i32, %arg2: i32) -> (i32, i32) {
    %c0_i32 = arith.constant 0 : i32
    %c0_i32_0 = arith.constant 0 : i32
    return %c0_i32, %arg1 : i32, i32
  }
  func.func @transform_3(%arg0: i32, %arg1: i32, %arg2: i32) -> (i32, i32) {
    %c0_i32 = arith.constant 0 : i32
    return %arg0, %arg1 : i32, i32
  }
}

</mosaic_0001>

<bundles_post_ra>
// kernel: transformer_decoder_forward.18
= control target key start
LH: loop header
LB: loop body
LE: loop exit
PB: predicated region body
PF: predicated region fallthrough
CT: control target
= control target key end

     0   :  { %vm19_vm0 = vcmask 785408   ;;  %v132_v0 = vmov 0.0   ;;  %vm133_vm1 = vmmov 0   ;;  %vm43_vm2 = vcmask 261120   ;;  %s181_s1 = inlined_call_operand.vmem [shape: bf16[32,96], index: 1, kind: input, shape index: {}]   ;;  %s182_s0 = inlined_call_operand.vmem [shape: f32[16,32], index: 0, kind: input, shape index: {}]   ;;  %s183_s2 = inlined_call_operand.vmem [shape: f32[1,96], index: 2, kind: input, shape index: {}]   ;;  %s184_s3 = inlined_call_operand.vmem [shape: f32[16,96], index: 3, kind: output, shape index: {}]  }
   0x1   :  { %120 = vmatprep.subr.bf16.mxu0 %v132_v0  ;;  %v130_v1 = vld [vmem:[%s181_s1] sm:$0xff]   ;;  %124 = vmatprep.mubr.msk.bf16.mxu0 %vm133_vm1, %v132_v0  ;;  %20 = vst.msk [vmem:[#allocation2] sm:$0xff] %vm19_vm0, %v132_v0  ;;  %21 = vst.msk [vmem:[#allocation2 + $0x8] sm:$0xff] %vm19_vm0, %v132_v0  ;;  %v131_v2 = vld [vmem:[%s181_s1 + $0x8] sm:$0xff]  }
   0x2   :  { %121 = vmatpush3.bf16.msra.mxu0 %v130_v1  ;;  %v24_v3 = vld [vmem:[%s182_s0] sm:$0xff]  ;;  %v25_v4 = vld [vmem:[%s182_s0 + $0x8] sm:$0xff] }
   0x3   :  { %122 = vmatprep.subr.bf16.mxu0 %v132_v0  ;;  %v26_v5 = vpack.c.bf16 %v25_v4, %v24_v3  ;;  %v116_v14 = vld [vmem:[%s183_s2] ss:$0 sm:$0xff] }
   0x6   :  { %123 = vmatpush3.bf16.msra.mxu0 %v131_v2 }
   0x8   :  { %v22_v6 = vld [vmem:[#allocation2] sm:$0xff]  ;;  %v23_v8 = vld [vmem:[#allocation2 + $0x8] sm:$0xff] }
   0x9   :  { %125 = vmatmul.mubr.msk.bf16.vlgmr.msra.gmra.mrb[0].mxu0 %vm43_vm2, %v26_v5 }
  0xdc   :  { %v81_v7 = vpop.f32.mrb[0].mxu0 }
  0xdd   :  { %v88_v9 = vadd.f32 %v81_v7, %v22_v6  ;;  %v126_v10 = vpop.f32.mrb[1].mxu0 }
  0xde   :  { %v84_v11 = vpop.f32.mrb[2].mxu0 }
  0xdf   :  { %91 = vst.msk [vmem:[#allocation2] sm:$0xff] %vm19_vm0, %v88_v9  ;;  %v89_v12 = vadd.f32 %v84_v11, %v23_v8  ;;  %v127_v13 = vpop.f32.mrb[3].mxu0 }
  0xe1   :  { %92 = vst.msk [vmem:[#allocation2 + $0x8] sm:$0xff] %vm19_vm0, %v89_v12 }
  0xe6   :  { %v96_v15 = vld [vmem:[#allocation2] sm:$0xff] }
  0xe7   :  { %v105_v16 = vadd.f32 %v116_v14, %v96_v15 }
  0xe8   :  { %v97_v17 = vld [vmem:[#allocation2 + $0x8] sm:$0xff] }
  0xe9   :  { %107 = vst.msk [vmem:[%s184_s3] sm:$0xff] %vm19_vm0, %v105_v16  ;;  %v106_v18 = vadd.f32 %v116_v14, %v97_v17 }
  0xeb   :  { %108 = vst.msk [vmem:[%s184_s3 + $0x8] sm:$0xff] %vm19_vm0, %v106_v18 }

// kernel: transformer_decoder_forward.20
= control target key start
LH: loop header
LB: loop body
LE: loop exit
PB: predicated region body
PF: predicated region fallthrough
CT: control target
= control target key end

     0   :  { %vm28_vm0 = vcmask 261120   ;;  %v195_v0 = vmov 0.0   ;;  %vm196_vm1 = vmmov 0   ;;  %s276_s1 = inlined_call_operand.vmem [shape: bf16[32,32], index: 1, kind: input, shape index: {}]   ;;  %s277_s0 = inlined_call_operand.vmem [shape: f32[16,32], index: 0, kind: input, shape index: {}]   ;;  %s278_s2 = inlined_call_operand.vmem [shape: f32[1,32], index: 2, kind: input, shape index: {}]   ;;  %s279_s3 = inlined_call_operand.vmem [shape: f32[16,32], index: 3, kind: input, shape index: {}]   ;;  %s280_s4 = inlined_call_operand.vmem [shape: f32[1,32], index: 4, kind: input, shape index: {}]   ;;  %s281_s5 = inlined_call_operand.vmem [shape: f32[1,32], index: 5, kind: input, shape index: {}]   ;;  %s282_s6 = inlined_call_operand.vmem [shape: f32[16,32], index: 6, kind: output, shape index: {}]  }
   0x1   :  { %179 = vmatprep.subr.bf16.mxu0 %v195_v0  ;;  %v189_v1 = vld [vmem:[%s276_s1] sm:$0xff]   ;;  %183 = vmatprep.mubr.msk.bf16.mxu0 %vm196_vm1, %v195_v0  ;;  %29 = vst.msk [vmem:[#allocation2] sm:$0xff] %vm28_vm0, %v195_v0  ;;  %30 = vst.msk [vmem:[#allocation2 + $0x8] sm:$0xff] %vm28_vm0, %v195_v0  ;;  %v190_v2 = vld [vmem:[%s276_s1 + $0x8] sm:$0xff]  }
   0x2   :  { %180 = vmatpush3.bf16.msra.mxu0 %v189_v1  ;;  %v33_v3 = vld [vmem:[%s277_s0] sm:$0xff]  ;;  %v34_v4 = vld [vmem:[%s277_s0 + $0x8] sm:$0xff] }
   0x3   :  { %181 = vmatprep.subr.bf16.mxu0 %v195_v0  ;;  %v35_v5 = vpack.c.bf16 %v34_v4, %v33_v3  ;;  %v173_v14 = vld [vmem:[%s278_s2] ss:$0 sm:$0xff]  ;;  %v116_v19 = vld [vmem:[%s279_s3 + $0x8] sm:$0xff] }
   0x4   :  { %v115_v16 = vld [vmem:[%s279_s3] sm:$0xff] }
   0x5   :  { %v174_v42 = vld [vmem:[%s280_s4] ss:$0 sm:$0xff] }
   0x6   :  { %182 = vmatpush3.bf16.msra.mxu0 %v190_v2  ;;  %v175_v44 = vld [vmem:[%s281_s5] ss:$0 sm:$0xff] }
   0x8   :  { %v31_v6 = vld [vmem:[#allocation2] sm:$0xff]  ;;  %v32_v8 = vld [vmem:[#allocation2 + $0x8] sm:$0xff] }
   0x9   :  { %184 = vmatmul.mubr.msk.bf16.vlgmr.msra.gmra.mrb[0].mxu0 %vm28_vm0, %v35_v5 }
  0xdc   :  { %v90_v7 = vpop.f32.mrb[0].mxu0 }
  0xdd   :  { %v97_v9 = vadd.f32 %v90_v7, %v31_v6  ;;  %v185_v10 = vpop.f32.mrb[1].mxu0 }
  0xde   :  { %v93_v11 = vpop.f32.mrb[2].mxu0 }
  0xdf   :  { %99 = vst.msk [vmem:[#allocation2] sm:$0xff] %vm28_vm0, %v97_v9  ;;  %v98_v12 = vadd.f32 %v93_v11, %v32_v8  ;;  %v186_v13 = vpop.f32.mrb[3].mxu0 }
  0xe1   :  { %100 = vst.msk [vmem:[#allocation2 + $0x8] sm:$0xff] %vm28_vm0, %v98_v12 }
  0xe6   :  { %v104_v15 = vld [vmem:[#allocation2] sm:$0xff] }
  0xe7   :  { %v113_v17 = vadd.f32 %v173_v14, %v104_v15 }
  0xe8   :  { %v105_v18 = vld [vmem:[#allocation2 + $0x8] sm:$0xff] }
  0xe9   :  { %v117_v20 = vadd.f32 %v115_v16, %v113_v17  ;;  %v114_v21 = vadd.f32 %v173_v14, %v105_v18 }
  0xeb   :  { %v119_v22 = vsel %vm28_vm0, %v117_v20, 0.0  ;;  %v118_v23 = vadd.f32 %v116_v19, %v114_v21 }
  0xec   :  { %120 = vadd.xlane.f32.xlu0 %v119_v22 }
  0xed   :  { %v122_v24 = vsel %vm28_vm0, %v118_v23, 0.0 }
  0xf0   :  { %123 = vadd.xlane.f32.xlu0 %v122_v24 }
 0x179   :  { %v121_v25 = vpop.xlane.xlu0 %120 }
 0x17a   :  { %v126_v26 = vmul.f32 0.03125, %v121_v25 }
 0x17c   :  { %v128_v27 = vsub.f32 %v117_v20, %v126_v26 }
 0x17d   :  { %v124_v28 = vpop.xlane.xlu0 %123 }
 0x17e   :  { %v127_v29 = vmul.f32 0.03125, %v124_v28  ;;  %v130_v30 = vmul.f32 %v128_v27, %v128_v27 }
 0x180   :  { %v129_v31 = vsub.f32 %v118_v23, %v127_v29  ;;  %v132_v32 = vsel %vm28_vm0, %v130_v30, 0.0 }
 0x181   :  { %133 = vadd.xlane.f32.xlu1 %v132_v32 }
 0x182   :  { %v131_v33 = vmul.f32 %v129_v31, %v129_v31 }
 0x184   :  { %v135_v34 = vsel %vm28_vm0, %v131_v33, 0.0 }
 0x185   :  { %136 = vadd.xlane.f32.xlu1 %v135_v34 }
 0x20e   :  { %v134_v35 = vpop.xlane.xlu1 %133 }
 0x20f   :  { %v138_v36 = vmul.f32 0.03125, %v134_v35 }
 0x211   :  { %v140_v37 = vadd.f32 1e-05, %v138_v36 }
 0x212   :  { %v137_v38 = vpop.xlane.xlu1 %136 }
 0x213   :  { %191 = vrsqrt.f32 %v140_v37  ;;  %v139_v39 = vmul.f32 0.03125, %v137_v38 }
 0x215   :  { %v141_v40 = vadd.f32 1e-05, %v139_v39 }
 0x217   :  { %193 = vrsqrt.f32 %v141_v40 }
 0x21d   :  { %v192_v41 = vpop.eup %191 }
 0x21e   :  { %v144_v43 = vmul.f32 %v192_v41, %v128_v27 }
 0x220   :  { %v153_v45 = vmul.f32 %v174_v42, %v144_v43 }
 0x221   :  { %v194_v46 = vpop.eup %193 }
 0x222   :  { %v162_v47 = vadd.f32 %v175_v44, %v153_v45  ;;  %v145_v48 = vmul.f32 %v194_v46, %v129_v31 }
 0x224   :  { %164 = vst.msk [vmem:[%s282_s6] sm:$0xff] %vm28_vm0, %v162_v47  ;;  %v154_v49 = vmul.f32 %v174_v42, %v145_v48 }
 0x226   :  { %v163_v50 = vadd.f32 %v175_v44, %v154_v49 }
 0x228   :  { %165 = vst.msk [vmem:[%s282_s6 + $0x8] sm:$0xff] %vm28_vm0, %v163_v50 }

// kernel: transformer_decoder_forward.21
= control target key start
LH: loop header
LB: loop body
LE: loop exit
PB: predicated region body
PF: predicated region fallthrough
CT: control target
= control target key end

     0   :  { %vm19_vm0 = vcmask 261120   ;;  %v131_v0 = vmov 0.0   ;;  %vm132_vm1 = vmmov 0   ;;  %s181_s1 = inlined_call_operand.vmem [shape: bf16[32,32], index: 1, kind: input, shape index: {}]   ;;  %s182_s0 = inlined_call_operand.vmem [shape: f32[16,32], index: 0, kind: input, shape index: {}]   ;;  %s183_s2 = inlined_call_operand.vmem [shape: f32[1,32], index: 2, kind: input, shape index: {}]   ;;  %s184_s3 = inlined_call_operand.vmem [shape: f32[16,32], index: 3, kind: output, shape index: {}]  }
   0x1   :  { %119 = vmatprep.subr.bf16.mxu0 %v131_v0  ;;  %v129_v1 = vld [vmem:[%s181_s1] sm:$0xff]   ;;  %123 = vmatprep.mubr.msk.bf16.mxu0 %vm132_vm1, %v131_v0  ;;  %20 = vst.msk [vmem:[#allocation2] sm:$0xff] %vm19_vm0, %v131_v0  ;;  %21 = vst.msk [vmem:[#allocation2 + $0x8] sm:$0xff] %vm19_vm0, %v131_v0  ;;  %v130_v2 = vld [vmem:[%s181_s1 + $0x8] sm:$0xff]  }
   0x2   :  { %120 = vmatpush3.bf16.msra.mxu0 %v129_v1  ;;  %v24_v3 = vld [vmem:[%s182_s0] sm:$0xff]  ;;  %v25_v4 = vld [vmem:[%s182_s0 + $0x8] sm:$0xff] }
   0x3   :  { %121 = vmatprep.subr.bf16.mxu0 %v131_v0  ;;  %v26_v5 = vpack.c.bf16 %v25_v4, %v24_v3  ;;  %v115_v14 = vld [vmem:[%s183_s2] ss:$0 sm:$0xff] }
   0x6   :  { %122 = vmatpush3.bf16.msra.mxu0 %v130_v2 }
   0x8   :  { %v22_v6 = vld [vmem:[#allocation2] sm:$0xff]  ;;  %v23_v8 = vld [vmem:[#allocation2 + $0x8] sm:$0xff] }
   0x9   :  { %124 = vmatmul.mubr.msk.bf16.vlgmr.msra.gmra.mrb[0].mxu0 %vm19_vm0, %v26_v5 }
  0xdc   :  { %v81_v7 = vpop.f32.mrb[0].mxu0 }
  0xdd   :  { %v88_v9 = vadd.f32 %v81_v7, %v22_v6  ;;  %v125_v10 = vpop.f32.mrb[1].mxu0 }
  0xde   :  { %v84_v11 = vpop.f32.mrb[2].mxu0 }
  0xdf   :  { %90 = vst.msk [vmem:[#allocation2] sm:$0xff] %vm19_vm0, %v88_v9  ;;  %v89_v12 = vadd.f32 %v84_v11, %v23_v8  ;;  %v126_v13 = vpop.f32.mrb[3].mxu0 }
  0xe1   :  { %91 = vst.msk [vmem:[#allocation2 + $0x8] sm:$0xff] %vm19_vm0, %v89_v12 }
  0xe6   :  { %v95_v15 = vld [vmem:[#allocation2] sm:$0xff] }
  0xe7   :  { %v104_v16 = vadd.f32 %v115_v14, %v95_v15 }
  0xe8   :  { %v96_v17 = vld [vmem:[#allocation2 + $0x8] sm:$0xff] }
  0xe9   :  { %106 = vst.msk [vmem:[%s184_s3] sm:$0xff] %vm19_vm0, %v104_v16  ;;  %v105_v18 = vadd.f32 %v115_v14, %v96_v17 }
  0xeb   :  { %107 = vst.msk [vmem:[%s184_s3 + $0x8] sm:$0xff] %vm19_vm0, %v105_v18 }

// kernel: transformer_decoder_forward.19
= control target key start
LH: loop header
LB: loop body
LE: loop exit
PB: predicated region body
PF: predicated region fallthrough
CT: control target
= control target key end

     0   :  { %s1348_s15 = smov 0   ;;  %s1672_s0 = inlined_call_operand.vmem [shape: f32[2,4,8,8], index: 0, kind: input, shape index: {}]   ;;  %s1673_s1 = inlined_call_operand.vmem [shape: f32[2,4,128,8], index: 1, kind: input, shape index: {}]   ;;  %s1674_s2 = inlined_call_operand.vmem [shape: f32[2,4,128,8], index: 2, kind: input, shape index: {}]   ;;  %s1675_s3 = inlined_call_operand.vmem [shape: f32[2,1,128], index: 3, kind: input, shape index: {}]   ;;  %s1676_s4 = inlined_call_operand.vmem [shape: f32[2,4,8,8], index: 4, kind: output, shape index: {}]  }
   0x1 LB: > { %s1030_s16 = sadd.s32 4294967295, %s1318_s15   ;;  %p1034_p0 = scmp.ge.s32.totalorder %s1318_s15, 1  ;;  %s1318_s15 = sphi %s1348_s15, %s14_s15  }
   0x2   : > { %p190_p1 = scmp.lt.s32.totalorder %s1318_s15, 3 }
   0x4   : > { %p191_p2 = pnand %p1034_p0, %p190_p1 }
   0x5   : > { %p229_p3 = scmp.lt.s32.totalorder (!%p191_p2), %s1030_s16, 1  ;;  %v1320_v0 = vmov (!%p191_p2), 0.0   ;;  %vm1321_vm0 = vmmov (!%p191_p2), 0   ;;  %vm453_vm1 = vcmask (!%p191_p2), 64512  }
   0x6   : > { %194 = sbr.rel (%p191_p2) target bundleno = 740 (0x2e4), region = 36  ;;  %1125 = vmatprep.subr.bf16.mxu0 (!%p191_p2), %v1320_v0  ;;  %1145 = vmatprep.subr.bf16.mxu1 (!%p191_p2), %v1320_v0 }
   0x7   : > { %1141 = vmatprep.mubr.msk.bf16.mxu0 (!%p191_p2), %vm1321_vm0, %v1320_v0  ;;  %1161 = vmatprep.mubr.msk.bf16.mxu1 (!%p191_p2), %vm1321_vm0, %v1320_v0 }
   0xd   : > { %s1678_s16 = smov (!%p229_p3, %s1030_s16), 1 }
   0xe   : > { %s1050_s17 = sshll.u32 %s1678_s16, 9  ;;  %s1049_s21 = sshll.u32 %s1678_s16, 5 }
   0xf   : > { %s1370_s20 = scalar_lea.vmem %s1673_s1, %s1050_s17  ;;  %s1439_s24 = scalar_lea.vmem %s1672_s0, %s1049_s21 }
  0x10   : > { %v261_v1 = vld [vmem:[%s1370_s20] sm:$0xff]  ;;  %v262_v2 = vld [vmem:[%s1370_s20 + $0x8] sm:$0xff]  ;;  %v263_v7 = vld [vmem:[%s1370_s20 + $0x10] sm:$0xff]  ;;  %s1529_s27 = scalar_lea.vmem %s1674_s2, %s1050_s17  ;;  %s246_s30 = scalar_lea.vmem %s1675_s3, %s1678_s16 }
  0x11   : > { %v277_v3 = vld [vmem:[%s1370_s20 + $0x80] sm:$0xff]  ;;  %v325_v4 = vpack.c.bf16 %v262_v2, %v261_v1  ;;  %v278_v5 = vld [vmem:[%s1370_s20 + $0x88] sm:$0xff]  ;;  %v264_v8 = vld [vmem:[%s1370_s20 + $0x18] sm:$0xff]  ;;  %s251_s7 = scalar_lea.vmem %s1676_s4, %s1049_s21 }
  0x12   : > { %v333_v6 = vpack.c.bf16 %v278_v5, %v277_v3  ;;  %v279_v10 = vld [vmem:[%s1370_s20 + $0x90] sm:$0xff]  ;;  %v280_v11 = vld [vmem:[%s1370_s20 + $0x98] sm:$0xff]  ;;  %v326_v13 = vpack.c.bf16 %v264_v8, %v263_v7  ;;  %v265_v17 = vld [vmem:[%s1370_s20 + $0x20] sm:$0xff] }
  0x13   : > { %v458_v9 = vsel %vm453_vm1, %v325_v4, 0  ;;  %v334_v14 = vpack.c.bf16 %v280_v11, %v279_v10  ;;  %v266_v18 = vld [vmem:[%s1370_s20 + $0x28] sm:$0xff]  ;;  %v281_v19 = vld [vmem:[%s1370_s20 + $0xa0] sm:$0xff]  ;;  %v267_v25 = vld [vmem:[%s1370_s20 + $0x30] sm:$0xff] }
  0x14   : > { %1126 = vmatpush3.bf16.xpose.msra.mxu0 %v458_v9  ;;  %v525_v12 = vsel %vm453_vm1, %v333_v6, 0  ;;  %v461_v15 = vsel %vm453_vm1, %v326_v13, 0  ;;  %v282_v20 = vld [vmem:[%s1370_s20 + $0xa8] sm:$0xff]  ;;  %v327_v21 = vpack.c.bf16 %v266_v18, %v265_v17  ;;  %v268_v26 = vld [vmem:[%s1370_s20 + $0x38] sm:$0xff]  ;;  %v283_v27 = vld [vmem:[%s1370_s20 + $0xb0] sm:$0xff] }
  0x15   : > { %1146 = vmatpush3.bf16.xpose.msra.mxu1 %v525_v12  ;;  %1127 = vmatprep.subr.bf16.mxu0 %v1320_v0  ;;  %v528_v16 = vsel %vm453_vm1, %v334_v14, 0  ;;  %v335_v22 = vpack.c.bf16 %v282_v20, %v281_v19  ;;  %v284_v28 = vld [vmem:[%s1370_s20 + $0xb8] sm:$0xff]  ;;  %v328_v29 = vpack.c.bf16 %v268_v26, %v267_v25  ;;  %v269_v33 = vld [vmem:[%s1370_s20 + $0x40] sm:$0xff]  ;;  %v270_v34 = vld [vmem:[%s1370_s20 + $0x48] sm:$0xff] }
  0x16   : > { %1147 = vmatprep.subr.bf16.mxu1 %v1320_v0  ;;  %v464_v23 = vsel %vm453_vm1, %v327_v21, 0  ;;  %v336_v30 = vpack.c.bf16 %v284_v28, %v283_v27  ;;  %v285_v35 = vld [vmem:[%s1370_s20 + $0xc0] sm:$0xff]  ;;  %v286_v36 = vld [vmem:[%s1370_s20 + $0xc8] sm:$0xff]  ;;  %v329_v37 = vpack.c.bf16 %v270_v34, %v269_v33  ;;  %v271_v41 = vld [vmem:[%s1370_s20 + $0x50] sm:$0xff] }
  0x17   : > { %v531_v24 = vsel %vm453_vm1, %v335_v22, 0  ;;  %v467_v31 = vsel %vm453_vm1, %v328_v29, 0  ;;  %v337_v38 = vpack.c.bf16 %v286_v36, %v285_v35  ;;  %v272_v42 = vld [vmem:[%s1370_s20 + $0x58] sm:$0xff]  ;;  %v287_v43 = vld [vmem:[%s1370_s20 + $0xd0] sm:$0xff]  ;;  %v273_v49 = vld [vmem:[%s1370_s20 + $0x60] sm:$0xff] }
  0x18   : > { %v534_v32 = vsel %vm453_vm1, %v336_v30, 0  ;;  %v470_v39 = vsel %vm453_vm1, %v329_v37, 0  ;;  %v288_v44 = vld [vmem:[%s1370_s20 + $0xd8] sm:$0xff]  ;;  %v330_v45 = vpack.c.bf16 %v272_v42, %v271_v41  ;;  %v274_v50 = vld [vmem:[%s1370_s20 + $0x68] sm:$0xff]  ;;  %v289_v51 = vld [vmem:[%s1370_s20 + $0xe0] sm:$0xff] }
  0x19   : > { %v537_v40 = vsel %vm453_vm1, %v337_v38, 0  ;;  %v338_v46 = vpack.c.bf16 %v288_v44, %v287_v43  ;;  %v290_v52 = vld [vmem:[%s1370_s20 + $0xe8] sm:$0xff]  ;;  %v331_v53 = vpack.c.bf16 %v274_v50, %v273_v49  ;;  %v275_v57 = vld [vmem:[%s1370_s20 + $0x70] sm:$0xff]  ;;  %v276_v58 = vld [vmem:[%s1370_s20 + $0x78] sm:$0xff] }
  0x1a   : > { %v473_v47 = vsel %vm453_vm1, %v330_v45, 0  ;;  %v339_v54 = vpack.c.bf16 %v290_v52, %v289_v51  ;;  %v291_v59 = vld [vmem:[%s1370_s20 + $0xf0] sm:$0xff]  ;;  %v292_v60 = vld [vmem:[%s1370_s20 + $0xf8] sm:$0xff]  ;;  %v332_v61 = vpack.c.bf16 %v276_v58, %v275_v57  ;;  %v293_v2 = vld [vmem:[%s1370_s20 + $0x100] sm:$0xff] }
  0x1b   : > { %v540_v48 = vsel %vm453_vm1, %v338_v46, 0  ;;  %v476_v55 = vsel %vm453_vm1, %v331_v53, 0  ;;  %v340_v62 = vpack.c.bf16 %v292_v60, %v291_v59  ;;  %v294_v3 = vld [vmem:[%s1370_s20 + $0x108] sm:$0xff]  ;;  %v309_v4 = vld [vmem:[%s1370_s20 + $0x180] sm:$0xff]  ;;  %v295_v14 = vld [vmem:[%s1370_s20 + $0x110] sm:$0xff] }
  0x1c   : > { %1128 = vmatpush3.bf16.xpose.msra.mxu0 %v461_v15  ;;  %v543_v56 = vsel %vm453_vm1, %v339_v54, 0  ;;  %v479_v63 = vsel %vm453_vm1, %v332_v61, 0  ;;  %v310_v5 = vld [vmem:[%s1370_s20 + $0x188] sm:$0xff]  ;;  %v253_v6 = vld [vmem:[%s1439_s24] sm:$0xff]  ;;  %v341_v7 = vpack.c.bf16 %v294_v3, %v293_v2  ;;  %v296_v15 = vld [vmem:[%s1370_s20 + $0x118] sm:$0xff] }
  0x1d   : > { %1148 = vmatpush3.bf16.xpose.msra.mxu1 %v528_v16  ;;  %1129 = vmatprep.subr.bf16.mxu0 %v1320_v0  ;;  %v546_v1 = vsel %vm453_vm1, %v340_v62, 0  ;;  %v254_v8 = vld [vmem:[%s1439_s24 + $0x8] sm:$0xff]  ;;  %v349_v9 = vpack.c.bf16 %v310_v5, %v309_v4  ;;  %v257_v10 = vpack.c.bf16 %v253_v6, %v253_v6  ;;  %v311_v16 = vld [vmem:[%s1370_s20 + $0x190] sm:$0xff]  ;;  %v312_v17 = vld [vmem:[%s1370_s20 + $0x198] sm:$0xff]  ;;  %v342_v18 = vpack.c.bf16 %v296_v15, %v295_v14 }
  0x1e   : > { %1149 = vmatprep.subr.bf16.mxu1 %v1320_v0  ;;  %v258_v11 = vpack.c.bf16 %v254_v8, %v254_v8  ;;  %v592_v12 = vsel %vm453_vm1, %v341_v7, 0  ;;  %v350_v19 = vpack.c.bf16 %v312_v17, %v311_v16  ;;  %v297_v22 = vld [vmem:[%s1370_s20 + $0x120] sm:$0xff]  ;;  %v314_v25 = vld [vmem:[%s1370_s20 + $0x1a8] sm:$0xff]  ;;  %v299_v30 = vld [vmem:[%s1370_s20 + $0x130] sm:$0xff] }
  0x1f   : > { %v659_v13 = vsel %vm453_vm1, %v349_v9, 0  ;;  %v595_v20 = vsel %vm453_vm1, %v342_v18, 0  ;;  %v316_v33 = vld [vmem:[%s1370_s20 + $0x1b8] sm:$0xff]  ;;  %v301_v38 = vld [vmem:[%s1370_s20 + $0x140] sm:$0xff]  ;;  %v318_v41 = vld [vmem:[%s1370_s20 + $0x1c8] sm:$0xff] }
  0x20   : > { %v662_v21 = vsel %vm453_vm1, %v350_v19, 0  ;;  %v303_v46 = vld [vmem:[%s1370_s20 + $0x150] sm:$0xff]  ;;  %v320_v49 = vld [vmem:[%s1370_s20 + $0x1d8] sm:$0xff]  ;;  %v305_v54 = vld [vmem:[%s1370_s20 + $0x160] sm:$0xff] }
  0x21   : > { %v322_v57 = vld [vmem:[%s1370_s20 + $0x1e8] sm:$0xff]  ;;  %v307_v62 = vld [vmem:[%s1370_s20 + $0x170] sm:$0xff]  ;;  %v324_v2 = vld [vmem:[%s1370_s20 + $0x1f8] sm:$0xff] }
  0x22   : > { %v255_v7 = vld [vmem:[%s1439_s24 + $0x10] sm:$0xff]  ;;  %v256_v8 = vld [vmem:[%s1439_s24 + $0x18] sm:$0xff]  ;;  %v373_v16 = vld [vmem:[%s1529_s27 + $0x80] sm:$0xff] }
  0x23   : > { %v259_v9 = vpack.c.bf16 %v255_v7, %v255_v7  ;;  %v360_v15 = vld [vmem:[%s1529_s27 + $0x18] sm:$0xff]  ;;  %v374_v17 = vld [vmem:[%s1529_s27 + $0x88] sm:$0xff]  ;;  %v375_v19 = vld [vmem:[%s1529_s27 + $0x90] sm:$0xff] }
  0x24   : > { %1130 = vmatpush3.bf16.xpose.msra.mxu0 %v464_v23  ;;  %v298_v23 = vld [vmem:[%s1370_s20 + $0x128] sm:$0xff]  ;;  %v429_v18 = vpack.c.bf16 %v374_v17, %v373_v16 }
  0x25   : > { %1150 = vmatpush3.bf16.xpose.msra.mxu1 %v531_v24  ;;  %1131 = vmatprep.subr.bf16.mxu0 %v1320_v0  ;;  %v313_v24 = vld [vmem:[%s1370_s20 + $0x1a0] sm:$0xff]  ;;  %v343_v26 = vpack.c.bf16 %v298_v23, %v297_v22  ;;  %v362_v23 = vld [vmem:[%s1529_s27 + $0x28] sm:$0xff] }
  0x26   : > { %1151 = vmatprep.subr.bf16.mxu1 %v1320_v0  ;;  %v351_v27 = vpack.c.bf16 %v314_v25, %v313_v24  ;;  %v361_v22 = vld [vmem:[%s1529_s27 + $0x20] sm:$0xff] }
  0x27   : > { %v598_v28 = vsel %vm453_vm1, %v343_v26, 0  ;;  %v377_v25 = vld [vmem:[%s1529_s27 + $0xa0] sm:$0xff]  ;;  %v378_v26 = vld [vmem:[%s1529_s27 + $0xa8] sm:$0xff] }
  0x28   : > { %v665_v29 = vsel %vm453_vm1, %v351_v27, 0  ;;  %v423_v27 = vpack.c.bf16 %v362_v23, %v361_v22 }
  0x2c   : > { %1132 = vmatpush3.bf16.xpose.msra.mxu0 %v467_v31  ;;  %v300_v31 = vld [vmem:[%s1370_s20 + $0x138] sm:$0xff] }
  0x2d   : > { %1152 = vmatpush3.bf16.xpose.msra.mxu1 %v534_v32  ;;  %1133 = vmatprep.subr.bf16.mxu0 %v1320_v0  ;;  %v315_v32 = vld [vmem:[%s1370_s20 + $0x1b0] sm:$0xff]  ;;  %v344_v34 = vpack.c.bf16 %v300_v31, %v299_v30  ;;  %v431_v30 = vpack.c.bf16 %v378_v26, %v377_v25 }
  0x2e   : > { %1153 = vmatprep.subr.bf16.mxu1 %v1320_v0  ;;  %v352_v35 = vpack.c.bf16 %v316_v33, %v315_v32  ;;  %v729_v32 = vlaneseq  ;;  %v726_v33 = vld [vmem:[%s246_s30] sm:$0x1] }
  0x2f   : > { %v601_v36 = vsel %vm453_vm1, %v344_v34, 0  ;;  %vm727_vm2 = vcmp.gt.f32.partialorder %v726_v33, 0.5  ;;  %v389_v33 = vld [vmem:[%s1529_s27 + $0x100] sm:$0xff] }
  0x30   : > { %v668_v37 = vsel %vm453_vm1, %v352_v35, 0  ;;  %v730_v34 = vshrl.u32 %v729_v32, 7 }
  0x32   : > { %v731_v35 = vsub.s32 0, %v730_v34  ;;  %v390_v34 = vld [vmem:[%s1529_s27 + $0x108] sm:$0xff] }
  0x34   : > { %1134 = vmatpush3.bf16.xpose.msra.mxu0 %v470_v39  ;;  %v302_v39 = vld [vmem:[%s1370_s20 + $0x148] sm:$0xff] }
  0x35   : > { %1154 = vmatpush3.bf16.xpose.msra.mxu1 %v537_v40  ;;  %1135 = vmatprep.subr.bf16.mxu0 %v1320_v0  ;;  %v317_v40 = vld [vmem:[%s1370_s20 + $0x1c0] sm:$0xff]  ;;  %v345_v42 = vpack.c.bf16 %v302_v39, %v301_v38 }
  0x36   : > { %1155 = vmatprep.subr.bf16.mxu1 %v1320_v0  ;;  %v353_v43 = vpack.c.bf16 %v318_v41, %v317_v40 }
  0x37   : > { %v604_v44 = vsel %vm453_vm1, %v345_v42, 0 }
  0x38   : > { %v671_v45 = vsel %vm453_vm1, %v353_v43, 0 }
  0x3c   : > { %1136 = vmatpush3.bf16.xpose.msra.mxu0 %v473_v47  ;;  %v304_v47 = vld [vmem:[%s1370_s20 + $0x158] sm:$0xff] }
  0x3d   : > { %1156 = vmatpush3.bf16.xpose.msra.mxu1 %v540_v48  ;;  %1137 = vmatprep.subr.bf16.mxu0 %v1320_v0  ;;  %v319_v48 = vld [vmem:[%s1370_s20 + $0x1d0] sm:$0xff]  ;;  %v346_v50 = vpack.c.bf16 %v304_v47, %v303_v46 }
  0x3e   : > { %1157 = vmatprep.subr.bf16.mxu1 %v1320_v0  ;;  %v354_v51 = vpack.c.bf16 %v320_v49, %v319_v48 }
  0x3f   : > { %v607_v52 = vsel %vm453_vm1, %v346_v50, 0 }
  0x40   : > { %v674_v53 = vsel %vm453_vm1, %v354_v51, 0  ;;  %v365_v51 = vld [vmem:[%s1529_s27 + $0x40] sm:$0xff] }
  0x44   : > { %1138 = vmatpush3.bf16.xpose.msra.mxu0 %v476_v55  ;;  %v306_v55 = vld [vmem:[%s1370_s20 + $0x168] sm:$0xff] }
  0x45   : > { %1158 = vmatpush3.bf16.xpose.msra.mxu1 %v543_v56  ;;  %1139 = vmatprep.subr.bf16.mxu0 %v1320_v0  ;;  %v321_v56 = vld [vmem:[%s1370_s20 + $0x1e0] sm:$0xff]  ;;  %v347_v58 = vpack.c.bf16 %v306_v55, %v305_v54  ;;  %v380_v55 = vld [vmem:[%s1529_s27 + $0xb8] sm:$0xff] }
  0x46   : > { %1159 = vmatprep.subr.bf16.mxu1 %v1320_v0  ;;  %v355_v59 = vpack.c.bf16 %v322_v57, %v321_v56  ;;  %v367_v57 = vld [vmem:[%s1529_s27 + $0x50] sm:$0xff] }
  0x47   : > { %v610_v60 = vsel %vm453_vm1, %v347_v58, 0  ;;  %v368_v58 = vld [vmem:[%s1529_s27 + $0x58] sm:$0xff] }
  0x48   : > { %v677_v61 = vsel %vm453_vm1, %v355_v59, 0  ;;  %v381_v59 = vld [vmem:[%s1529_s27 + $0xc0] sm:$0xff] }
  0x4c   : > { %1140 = vmatpush3.bf16.xpose.msra.mxu0 %v479_v63  ;;  %v308_v63 = vld [vmem:[%s1370_s20 + $0x178] sm:$0xff] }
  0x4d   : > { %1160 = vmatpush3.bf16.xpose.msra.mxu1 %v546_v1  ;;  %1165 = vmatprep.subr.bf16.mxu0 %v1320_v0  ;;  %v323_v1 = vld [vmem:[%s1370_s20 + $0x1f0] sm:$0xff]  ;;  %v348_v3 = vpack.c.bf16 %v308_v63, %v307_v62  ;;  %v369_v63 = vld [vmem:[%s1529_s27 + $0x60] sm:$0xff] }
  0x4e   : > { %1185 = vmatprep.subr.bf16.mxu1 %v1320_v0  ;;  %v356_v4 = vpack.c.bf16 %v324_v2, %v323_v1  ;;  %v370_v1 = vld [vmem:[%s1529_s27 + $0x68] sm:$0xff]  ;;  %v383_v2 = vld [vmem:[%s1529_s27 + $0xd0] sm:$0xff] }
  0x4f   : > { %v613_v5 = vsel %vm453_vm1, %v348_v3, 0  ;;  %v427_v3 = vpack.c.bf16 %v370_v1, %v369_v63  ;;  %v399_v1 = vld [vmem:[%s1529_s27 + $0x150] sm:$0xff] }
  0x50   : > { %v680_v6 = vsel %vm453_vm1, %v356_v4, 0  ;;  %v384_v4 = vld [vmem:[%s1529_s27 + $0xd8] sm:$0xff] }
  0x51   : > { %v434_v7 = vpack.c.bf16 %v384_v4, %v383_v2  ;;  %v400_v2 = vld [vmem:[%s1529_s27 + $0x158] sm:$0xff]  ;;  %v414_v4 = vld [vmem:[%s1529_s27 + $0x1c8] sm:$0xff] }
  0x53   : > { %1142 = vmatmul.mubr.msk.bf16.vlgmr.msra.gmra.mrb[0].mxu0 %vm453_vm1, %v257_v10  ;;  %v260_v10 = vpack.c.bf16 %v256_v8, %v256_v8  ;;  %v385_v8 = vld [vmem:[%s1529_s27 + $0xe0] sm:$0xff] }
  0x54   : > { %1166 = vmatpush3.bf16.xpose.msra.mxu0 %v592_v12  ;;  %1162 = vmatmul.mubr.msk.bf16.vlgmr.msra.gmra.mrb[0].mxu1 %vm453_vm1, %v258_v11  ;;  %v357_v11 = vld [vmem:[%s1529_s27] sm:$0xff]  ;;  %v358_v12 = vld [vmem:[%s1529_s27 + $0x8] sm:$0xff] }
  0x55   : > { %1186 = vmatpush3.bf16.xpose.msra.mxu1 %v659_v13  ;;  %1167 = vmatprep.subr.bf16.mxu0 %v1320_v0  ;;  %v359_v13 = vld [vmem:[%s1529_s27 + $0x10] sm:$0xff]  ;;  %v421_v14 = vpack.c.bf16 %v358_v12, %v357_v11 }
  0x56   : > { %1187 = vmatprep.subr.bf16.mxu1 %v1320_v0  ;;  %1181 = vmatprep.mubr.msk.bf16.mxu0 %vm1321_vm0, %v1320_v0  ;;  %v387_v12 = vld [vmem:[%s1529_s27 + $0xf0] sm:$0xff] }
  0x57   : > { %1201 = vmatprep.mubr.msk.bf16.mxu1 %vm1321_vm0, %v1320_v0 }
  0x5c   : > { %1168 = vmatpush3.bf16.xpose.msra.mxu0 %v595_v20  ;;  %v422_v20 = vpack.c.bf16 %v360_v15, %v359_v13  ;;  %v388_v13 = vld [vmem:[%s1529_s27 + $0xf8] sm:$0xff] }
  0x5d   : > { %1188 = vmatpush3.bf16.xpose.msra.mxu1 %v662_v21  ;;  %1169 = vmatprep.subr.bf16.mxu0 %v1320_v0  ;;  %v376_v21 = vld [vmem:[%s1529_s27 + $0x98] sm:$0xff] }
  0x5e   : > { %1189 = vmatprep.subr.bf16.mxu1 %v1320_v0  ;;  %v430_v24 = vpack.c.bf16 %v376_v21, %v375_v19 }
  0x64   : > { %1170 = vmatpush3.bf16.xpose.msra.mxu0 %v598_v28  ;;  %v363_v28 = vld [vmem:[%s1529_s27 + $0x30] sm:$0xff] }
  0x65   : > { %1190 = vmatpush3.bf16.xpose.msra.mxu1 %v665_v29  ;;  %1171 = vmatprep.subr.bf16.mxu0 %v1320_v0  ;;  %v364_v29 = vld [vmem:[%s1529_s27 + $0x38] sm:$0xff] }
  0x66   : > { %1191 = vmatprep.subr.bf16.mxu1 %v1320_v0  ;;  %v424_v31 = vpack.c.bf16 %v364_v29, %v363_v28 }
  0x6c   : > { %1172 = vmatpush3.bf16.xpose.msra.mxu0 %v601_v36  ;;  %v1322_v36 = vmov 0  }
  0x6d   : > { %1192 = vmatpush3.bf16.xpose.msra.mxu1 %v668_v37  ;;  %1173 = vmatprep.subr.bf16.mxu0 %v1320_v0  ;;  %v728_v37 = vsel %vm727_vm2, 1, %v1322_v36  ;;  %v437_v36 = vpack.c.bf16 %v390_v34, %v389_v33 }
  0x6e   : > { %1193 = vmatprep.subr.bf16.mxu1 %v1320_v0  ;;  %v1556_v38 = vrot.slane %v728_v37, %v731_v35  ;;  %v391_v37 = vld [vmem:[%s1529_s27 + $0x110] sm:$0xff] }
  0x70   : > { %vm733_vm3 = vcmp.eq.s32.totalorder %v1556_v38, 1 }
  0x74   : > { %1174 = vmatpush3.bf16.xpose.msra.mxu0 %v604_v44 }
  0x75   : > { %1194 = vmatpush3.bf16.xpose.msra.mxu1 %v671_v45  ;;  %1175 = vmatprep.subr.bf16.mxu0 %v1320_v0 }
  0x76   : > { %1195 = vmatprep.subr.bf16.mxu1 %v1320_v0 }
  0x7c   : > { %1176 = vmatpush3.bf16.xpose.msra.mxu0 %v607_v52  ;;  %v366_v52 = vld [vmem:[%s1529_s27 + $0x48] sm:$0xff] }
  0x7d   : > { %1196 = vmatpush3.bf16.xpose.msra.mxu1 %v674_v53  ;;  %1177 = vmatprep.subr.bf16.mxu0 %v1320_v0  ;;  %v379_v53 = vld [vmem:[%s1529_s27 + $0xb0] sm:$0xff]  ;;  %v425_v54 = vpack.c.bf16 %v366_v52, %v365_v51 }
  0x7e   : > { %1197 = vmatprep.subr.bf16.mxu1 %v1320_v0  ;;  %v432_v56 = vpack.c.bf16 %v380_v55, %v379_v53  ;;  %v395_v52 = vld [vmem:[%s1529_s27 + $0x130] sm:$0xff]  ;;  %v396_v53 = vld [vmem:[%s1529_s27 + $0x138] sm:$0xff]  ;;  %v410_v55 = vld [vmem:[%s1529_s27 + $0x1a8] sm:$0xff] }
  0x84   : > { %1178 = vmatpush3.bf16.xpose.msra.mxu0 %v610_v60  ;;  %v426_v60 = vpack.c.bf16 %v368_v58, %v367_v57  ;;  %v397_v58 = vld [vmem:[%s1529_s27 + $0x140] sm:$0xff] }
  0x85   : > { %1198 = vmatpush3.bf16.xpose.msra.mxu1 %v677_v61  ;;  %1179 = vmatprep.subr.bf16.mxu0 %v1320_v0  ;;  %v382_v61 = vld [vmem:[%s1529_s27 + $0xc8] sm:$0xff] }
  0x86   : > { %1199 = vmatprep.subr.bf16.mxu1 %v1320_v0  ;;  %v433_v62 = vpack.c.bf16 %v382_v61, %v381_v59  ;;  %v398_v59 = vld [vmem:[%s1529_s27 + $0x148] sm:$0xff]  ;;  %v412_v61 = vld [vmem:[%s1529_s27 + $0x1b8] sm:$0xff] }
  0x8c   : > { %1180 = vmatpush3.bf16.xpose.msra.mxu0 %v613_v5  ;;  %v371_v5 = vld [vmem:[%s1529_s27 + $0x70] sm:$0xff] }
  0x8d   : > { %1200 = vmatpush3.bf16.xpose.msra.mxu1 %v680_v6  ;;  %1205 = vmatprep.subr.bf16.mxu0 %v1320_v0  ;;  %v372_v6 = vld [vmem:[%s1529_s27 + $0x78] sm:$0xff] }
  0x8e   : > { %1225 = vmatprep.subr.bf16.mxu1 %v1320_v0 }
  0x93   : > { %1182 = vmatmul.mubr.msk.bf16.vlgmr.msra.gmra.mrb[4].mxu0 %vm453_vm1, %v259_v9  ;;  %v386_v9 = vld [vmem:[%s1529_s27 + $0xe8] sm:$0xff] }
  0x94   : > { %1202 = vmatmul.mubr.msk.bf16.vlgmr.msra.gmra.mrb[4].mxu1 %vm453_vm1, %v260_v10  ;;  %1221 = vmatprep.mubr.msk.bf16.mxu0 %vm1321_vm0, %v1320_v0  ;;  %v428_v10 = vpack.c.bf16 %v372_v6, %v371_v5  ;;  %v435_v11 = vpack.c.bf16 %v386_v9, %v385_v8  ;;  %v442_v5 = vpack.c.bf16 %v400_v2, %v399_v1  ;;  %v402_v8 = vld [vmem:[%s1529_s27 + $0x168] sm:$0xff]  ;;  %v415_v9 = vld [vmem:[%s1529_s27 + $0x1d0] sm:$0xff] }
  0x95   : > { %1241 = vmatprep.mubr.msk.bf16.mxu1 %vm1321_vm0, %v1320_v0  ;;  %1206 = vmatpush3.bf16.msra.mxu0 %v421_v14  ;;  %v436_v14 = vpack.c.bf16 %v388_v13, %v387_v12  ;;  %v403_v13 = vld [vmem:[%s1529_s27 + $0x170] sm:$0xff] }
  0x96   : > { %1207 = vmatprep.subr.bf16.mxu0 %v1320_v0  ;;  %1226 = vmatpush3.bf16.msra.mxu1 %v429_v18 }
  0x97   : > { %1227 = vmatprep.subr.bf16.mxu1 %v1320_v0 }
  0x99   : > { %1208 = vmatpush3.bf16.msra.mxu0 %v422_v20 }
  0x9a   : > { %1209 = vmatprep.subr.bf16.mxu0 %v1320_v0  ;;  %1228 = vmatpush3.bf16.msra.mxu1 %v430_v24 }
  0x9b   : > { %1229 = vmatprep.subr.bf16.mxu1 %v1320_v0 }
  0x9d   : > { %1210 = vmatpush3.bf16.msra.mxu0 %v423_v27 }
  0x9e   : > { %1211 = vmatprep.subr.bf16.mxu0 %v1320_v0  ;;  %1230 = vmatpush3.bf16.msra.mxu1 %v431_v30 }
  0x9f   : > { %1231 = vmatprep.subr.bf16.mxu1 %v1320_v0 }
  0xa1   : > { %1212 = vmatpush3.bf16.msra.mxu0 %v424_v31 }
  0xa2   : > { %1213 = vmatprep.subr.bf16.mxu0 %v1320_v0  ;;  %1232 = vmatpush3.bf16.msra.mxu1 %v432_v56  ;;  %v440_v56 = vpack.c.bf16 %v396_v53, %v395_v52 }
  0xa3   : > { %1233 = vmatprep.subr.bf16.mxu1 %v1320_v0 }
  0xa5   : > { %1214 = vmatpush3.bf16.msra.mxu0 %v425_v54  ;;  %v409_v54 = vld [vmem:[%s1529_s27 + $0x1a0] sm:$0xff] }
  0xa6   : > { %1215 = vmatprep.subr.bf16.mxu0 %v1320_v0  ;;  %1234 = vmatpush3.bf16.msra.mxu1 %v433_v62  ;;  %v447_v57 = vpack.c.bf16 %v410_v55, %v409_v54  ;;  %v441_v62 = vpack.c.bf16 %v398_v59, %v397_v58 }
  0xa7   : > { %1235 = vmatprep.subr.bf16.mxu1 %v1320_v0 }
  0xa9   : > { %1216 = vmatpush3.bf16.msra.mxu0 %v426_v60  ;;  %v411_v60 = vld [vmem:[%s1529_s27 + $0x1b0] sm:$0xff] }
  0xaa   : > { %1217 = vmatprep.subr.bf16.mxu0 %v1320_v0  ;;  %1236 = vmatpush3.bf16.msra.mxu1 %v434_v7  ;;  %v448_v63 = vpack.c.bf16 %v412_v61, %v411_v60  ;;  %v401_v7 = vld [vmem:[%s1529_s27 + $0x160] sm:$0xff] }
  0xab   : > { %1237 = vmatprep.subr.bf16.mxu1 %v1320_v0 }
  0xad   : > { %1218 = vmatpush3.bf16.msra.mxu0 %v427_v3  ;;  %v413_v3 = vld [vmem:[%s1529_s27 + $0x1c0] sm:$0xff] }
  0xae   : > { %1219 = vmatprep.subr.bf16.mxu0 %v1320_v0  ;;  %1238 = vmatpush3.bf16.msra.mxu1 %v435_v11  ;;  %v449_v6 = vpack.c.bf16 %v414_v4, %v413_v3  ;;  %v443_v11 = vpack.c.bf16 %v402_v8, %v401_v7 }
  0xaf   : > { %1239 = vmatprep.subr.bf16.mxu1 %v1320_v0 }
  0xb1   : > { %1220 = vmatpush3.bf16.msra.mxu0 %v428_v10  ;;  %v416_v10 = vld [vmem:[%s1529_s27 + $0x1d8] sm:$0xff] }
  0xb2   : > { %1245 = vmatprep.subr.bf16.mxu0 %v1320_v0  ;;  %1240 = vmatpush3.bf16.msra.mxu1 %v436_v14  ;;  %v450_v12 = vpack.c.bf16 %v416_v10, %v415_v9  ;;  %v404_v14 = vld [vmem:[%s1529_s27 + $0x178] sm:$0xff] }
  0xb3   : > { %1265 = vmatprep.subr.bf16.mxu1 %v1320_v0 }
 0x126   : > { %v515_v39 = vpop.f32.mrb[0].mxu0 }
 0x127   : > { %v722_v40 = vmul.f32 0.35355338, %v515_v39  ;;  %v1143_v41 = vpop.f32.mrb[1].mxu0  ;;  %v582_v42 = vpop.f32.mrb[0].mxu1  ;;  %v392_v39 = vld [vmem:[%s1529_s27 + $0x118] sm:$0xff] }
 0x128   : > { %v518_v43 = vpop.f32.mrb[2].mxu0  ;;  %v723_v44 = vmul.f32 0.35355338, %v582_v42  ;;  %v1163_v45 = vpop.f32.mrb[1].mxu1  ;;  %v406_v41 = vld [vmem:[%s1529_s27 + $0x188] sm:$0xff] }
 0x129   : > { %v1144_v46 = vpop.f32.mrb[3].mxu0  ;;  %v585_v47 = vpop.f32.mrb[2].mxu1  ;;  %v1561_v48 = vsel %vm733_vm3, -1e+30, %v722_v40  ;;  %v405_v40 = vld [vmem:[%s1529_s27 + $0x180] sm:$0xff]  ;;  %v438_v43 = vpack.c.bf16 %v392_v39, %v391_v37 }
 0x12a   : > { %738 = vmax.xlane.f32.xlu0 %v1561_v48  ;;  %v1164_v49 = vpop.f32.mrb[3].mxu1  ;;  %v1566_v50 = vsel %vm733_vm3, -1e+30, %v723_v44  ;;  %v445_v44 = vpack.c.bf16 %v406_v41, %v405_v40  ;;  %v393_v45 = vld [vmem:[%s1529_s27 + $0x120] sm:$0xff]  ;;  %v394_v47 = vld [vmem:[%s1529_s27 + $0x128] sm:$0xff] }
 0x12b   : > { %v408_v49 = vld [vmem:[%s1529_s27 + $0x198] sm:$0xff] }
 0x12e   : > { %740 = vmax.xlane.f32.xlu0 %v1566_v50 }
 0x166   : > { %v649_v15 = vpop.f32.mrb[4].mxu0 }
 0x167   : > { %v724_v16 = vmul.f32 0.35355338, %v649_v15  ;;  %v1183_v17 = vpop.f32.mrb[5].mxu0  ;;  %v716_v18 = vpop.f32.mrb[4].mxu1  ;;  %v417_v15 = vld [vmem:[%s1529_s27 + $0x1e0] sm:$0xff] }
 0x168   : > { %v725_v19 = vmul.f32 0.35355338, %v716_v18  ;;  %v652_v20 = vpop.f32.mrb[6].mxu0  ;;  %v1203_v21 = vpop.f32.mrb[5].mxu1  ;;  %v444_v17 = vpack.c.bf16 %v404_v14, %v403_v13 }
 0x169   : > { %v1184_v22 = vpop.f32.mrb[7].mxu0  ;;  %v719_v23 = vpop.f32.mrb[6].mxu1  ;;  %v1598_v24 = vsel %vm733_vm3, -1e+30, %v724_v16  ;;  %v418_v16 = vld [vmem:[%s1529_s27 + $0x1e8] sm:$0xff]  ;;  %v420_v20 = vld [vmem:[%s1529_s27 + $0x1f8] sm:$0xff] }
 0x16a   : > { %v1204_v25 = vpop.f32.mrb[7].mxu1  ;;  %742 = vmax.xlane.f32.xlu1 %v1598_v24  ;;  %v1603_v26 = vsel %vm733_vm3, -1e+30, %v725_v19  ;;  %v451_v18 = vpack.c.bf16 %v418_v16, %v417_v15  ;;  %v419_v19 = vld [vmem:[%s1529_s27 + $0x1f0] sm:$0xff] }
 0x16b   : > { %v452_v21 = vpack.c.bf16 %v420_v20, %v419_v19 }
 0x16e   : > { %744 = vmax.xlane.f32.xlu1 %v1603_v26 }
 0x1b7   : > { %v739_v27 = vpop.xlane.xlu0 %738 }
 0x1b8   : > { %v746_v28 = vsub.f32 %v1561_v48, %v739_v27  ;;  %v407_v48 = vld [vmem:[%s1529_s27 + $0x190] sm:$0xff] }
 0x1b9   : > { %v446_v51 = vpack.c.bf16 %v408_v49, %v407_v48 }
 0x1ba   : > { %v750_v29 = vmul.f32 1.442695, %v746_v28 }
 0x1bb   : > { %v741_v30 = vpop.xlane.xlu0 %740 }
 0x1bc   : > { %1296 = vpow2.f32 %v750_v29  ;;  %v747_v31 = vsub.f32 %v1566_v50, %v741_v30  ;;  %v439_v50 = vpack.c.bf16 %v394_v47, %v393_v45 }
 0x1be   : > { %v752_v32 = vmul.f32 1.442695, %v747_v31 }
 0x1c0   : > { %1298 = vpow2.f32 %v752_v32 }
 0x1c6   : > { %v1297_v35 = vpop.eup %1296 }
 0x1c7   : > { %758 = vadd.xlane.f32.xlu0 %v1297_v35  ;;  %v766_v38 = vpack.c.bf16 %v1297_v35, %v1297_v35 }
 0x1c9   : > { %1222 = vmatmul.mubr.bf16.vlgmr.msra.gmra.mrb[8].mxu0 %v766_v38 }
 0x1ca   : > { %v1299_v42 = vpop.eup %1298  ;;  %1246 = vmatpush3.bf16.msra.mxu0 %v437_v36  ;;  %1261 = vmatprep.mubr.msk.bf16.mxu0 %vm1321_vm0, %v1320_v0 }
 0x1cb   : > { %760 = vadd.xlane.f32.xlu1 %v1299_v42  ;;  %v767_v46 = vpack.c.bf16 %v1299_v42, %v1299_v42  ;;  %1247 = vmatprep.subr.bf16.mxu0 %v1320_v0 }
 0x1cd   : > { %1242 = vmatmul.mubr.bf16.vlgmr.msra.gmra.mrb[8].mxu1 %v767_v46 }
 0x1ce   : > { %1248 = vmatpush3.bf16.msra.mxu0 %v438_v43  ;;  %1266 = vmatpush3.bf16.msra.mxu1 %v445_v44 }
 0x1cf   : > { %1249 = vmatprep.subr.bf16.mxu0 %v1320_v0  ;;  %1267 = vmatprep.subr.bf16.mxu1 %v1320_v0 }
 0x1d0   : > { %1281 = vmatprep.mubr.msk.bf16.mxu1 %vm1321_vm0, %v1320_v0 }
 0x1d2   : > { %1250 = vmatpush3.bf16.msra.mxu0 %v439_v50  ;;  %1268 = vmatpush3.bf16.msra.mxu1 %v446_v51 }
 0x1d3   : > { %1251 = vmatprep.subr.bf16.mxu0 %v1320_v0  ;;  %1269 = vmatprep.subr.bf16.mxu1 %v1320_v0 }
 0x1d6   : > { %1252 = vmatpush3.bf16.msra.mxu0 %v440_v56  ;;  %1270 = vmatpush3.bf16.msra.mxu1 %v447_v57 }
 0x1d7   : > { %1253 = vmatprep.subr.bf16.mxu0 %v1320_v0  ;;  %1271 = vmatprep.subr.bf16.mxu1 %v1320_v0 }
 0x1da   : > { %1254 = vmatpush3.bf16.msra.mxu0 %v441_v62  ;;  %1272 = vmatpush3.bf16.msra.mxu1 %v448_v63 }
 0x1db   : > { %1255 = vmatprep.subr.bf16.mxu0 %v1320_v0  ;;  %1273 = vmatprep.subr.bf16.mxu1 %v1320_v0 }
 0x1de   : > { %1256 = vmatpush3.bf16.msra.mxu0 %v442_v5  ;;  %1274 = vmatpush3.bf16.msra.mxu1 %v449_v6 }
 0x1df   : > { %1257 = vmatprep.subr.bf16.mxu0 %v1320_v0  ;;  %1275 = vmatprep.subr.bf16.mxu1 %v1320_v0 }
 0x1e2   : > { %1258 = vmatpush3.bf16.msra.mxu0 %v443_v11  ;;  %1276 = vmatpush3.bf16.msra.mxu1 %v450_v12 }
 0x1e3   : > { %1259 = vmatprep.subr.bf16.mxu0 %v1320_v0  ;;  %1277 = vmatprep.subr.bf16.mxu1 %v1320_v0 }
 0x1e6   : > { %1260 = vmatpush3.bf16.msra.mxu0 %v444_v17  ;;  %1278 = vmatpush3.bf16.msra.mxu1 %v451_v18 }
 0x1e7   : > { %1279 = vmatprep.subr.bf16.mxu1 %v1320_v0 }
 0x1ea   : > { %1280 = vmatpush3.bf16.msra.mxu1 %v452_v21 }
 0x1f7   : > { %v743_v22 = vpop.xlane.xlu1 %742 }
 0x1f8   : > { %v748_v23 = vsub.f32 %v1598_v24, %v743_v22 }
 0x1fa   : > { %v754_v25 = vmul.f32 1.442695, %v748_v23 }
 0x1fb   : > { %v745_v27 = vpop.xlane.xlu1 %744 }
 0x1fc   : > { %1300 = vpow2.f32 %v754_v25  ;;  %v749_v28 = vsub.f32 %v1603_v26, %v745_v27 }
 0x1fe   : > { %v756_v29 = vmul.f32 1.442695, %v749_v28 }
 0x200   : > { %1302 = vpow2.f32 %v756_v29 }
 0x206   : > { %v1301_v30 = vpop.eup %1300 }
 0x207   : > { %762 = vadd.xlane.f32.xlu0 %v1301_v30  ;;  %v768_v31 = vpack.c.bf16 %v1301_v30, %v1301_v30 }
 0x209   : > { %1262 = vmatmul.mubr.bf16.vlgmr.msra.gmra.mrb[12].mxu0 %v768_v31 }
 0x20a   : > { %v1303_v32 = vpop.eup %1302 }
 0x20b   : > { %764 = vadd.xlane.f32.xlu1 %v1303_v32  ;;  %v769_v33 = vpack.c.bf16 %v1303_v32, %v1303_v32 }
 0x20d   : > { %1282 = vmatmul.mubr.bf16.vlgmr.msra.gmra.mrb[12].mxu1 %v769_v33 }
 0x254   : > { %v759_v0 = vpop.xlane.xlu0 %758 }
 0x255   : > { %1304 = vrcp.f32 %v759_v0 }
 0x258   : > { %v761_v34 = vpop.xlane.xlu1 %760 }
 0x259   : > { %1306 = vrcp.f32 %v761_v34 }
 0x25f   : > { %v1305_v24 = vpop.eup %1304 }
 0x263   : > { %v1307_v39 = vpop.eup %1306 }
 0x294   : > { %v763_v45 = vpop.xlane.xlu0 %762 }
 0x295   : > { %1308 = vrcp.f32 %v763_v45 }
 0x298   : > { %v765_v46 = vpop.xlane.xlu1 %764 }
 0x299   : > { %1310 = vrcp.f32 %v765_v46 }
 0x29c   : > { %v804_v26 = vpop.f32.mrb[8].mxu0 }
 0x29d   : > { %v934_v35 = vmul.f32 %v1305_v24, %v804_v26  ;;  %v1223_v36 = vpop.f32.mrb[9].mxu0 }
 0x29e   : > { %v807_v37 = vpop.f32.mrb[10].mxu0 }
 0x29f   : > { %938 = vst.msk [vmem:[%s251_s7] sm:$0xff] %vm453_vm1, %v934_v35  ;;  %v1224_v38 = vpop.f32.mrb[11].mxu0  ;;  %v1309_v47 = vpop.eup %1308 }
 0x2a0   : > { %v844_v40 = vpop.f32.mrb[8].mxu1 }
 0x2a1   : > { %v935_v41 = vmul.f32 %v1307_v39, %v844_v40  ;;  %v1243_v42 = vpop.f32.mrb[9].mxu1 }
 0x2a2   : > { %v847_v43 = vpop.f32.mrb[10].mxu1 }
 0x2a3   : > { %939 = vst.msk [vmem:[%s251_s7 + $0x8] sm:$0xff] %vm453_vm1, %v935_v41  ;;  %v1244_v44 = vpop.f32.mrb[11].mxu1  ;;  %v1311_v53 = vpop.eup %1310 }
 0x2dc   : > { %v884_v48 = vpop.f32.mrb[12].mxu0 }
 0x2dd   : > { %v936_v49 = vmul.f32 %v1309_v47, %v884_v48  ;;  %v1263_v50 = vpop.f32.mrb[13].mxu0 }
 0x2de   : > { %v887_v51 = vpop.f32.mrb[14].mxu0 }
 0x2df   : > { %940 = vst.msk [vmem:[%s251_s7 + $0x10] sm:$0xff] %vm453_vm1, %v936_v49  ;;  %v1264_v52 = vpop.f32.mrb[15].mxu0 }
 0x2e0   : > { %v924_v54 = vpop.f32.mrb[12].mxu1 }
 0x2e1   : > { %v937_v55 = vmul.f32 %v1311_v53, %v924_v54  ;;  %v1283_v56 = vpop.f32.mrb[13].mxu1 }
 0x2e2   : > { %v927_v57 = vpop.f32.mrb[14].mxu1 }
 0x2e3   : > { %941 = vst.msk [vmem:[%s251_s7 + $0x18] sm:$0xff] %vm453_vm1, %v937_v55  ;;  %v1284_v58 = vpop.f32.mrb[15].mxu1 }
 0x2e4 PF: > { %s14_s15 = sadd.s32 1, %s1318_s15  }
 0x2e5   : > { %p11_p4 = scmp.ge.s32.totalorder %s14_s15, 4  }
 0x2e7   :  { %13 = sbr.rel (!%p11_p4) target bundleno = 1 (0x1), region = 75 }

// kernel: transformer_decoder_forward.22
= control target key start
LH: loop header
LB: loop body
LE: loop exit
PB: predicated region body
PF: predicated region fallthrough
CT: control target
= control target key end

     0   :  { %vm19_vm0 = vcmask 523264   ;;  %v152_v1 = vmov 0.0   ;;  %vm47_vm1 = vcmask 261120   ;;  %s209_s1 = inlined_call_operand.vmem [shape: bf16[32,64], index: 1, kind: input, shape index: {}]   ;;  %s210_s0 = inlined_call_operand.vmem [shape: f32[24,32], index: 0, kind: input, shape index: {}]   ;;  %s211_s2 = inlined_call_operand.vmem [shape: f32[1,64], index: 2, kind: input, shape index: {}]   ;;  %s212_s3 = inlined_call_operand.vmem [shape: f32[24,64], index: 3, kind: output, shape index: {}]  }
   0x1   :  { %v150_v0 = vld [vmem:[%s209_s1] sm:$0xff]   ;;  %22 = vst.msk [vmem:[#allocation2 + $0x10] sm:$0xff] %vm19_vm0, %v152_v1  ;;  %20 = vst.msk [vmem:[#allocation2] sm:$0xff] %vm19_vm0, %v152_v1  ;;  %v151_v2 = vld [vmem:[%s209_s1 + $0x8] sm:$0xff]  }
   0x2   :  { %21 = vst.msk [vmem:[#allocation2 + $0x8] sm:$0xff] %vm19_vm0, %v152_v1  ;;  %141 = vmatprep.subr.bf16.mxu0 %v150_v0  ;;  %v26_v3 = vld [vmem:[%s210_s0] sm:$0xff]  ;;  %v27_v4 = vld [vmem:[%s210_s0 + $0x8] sm:$0xff]  ;;  %v28_v5 = vld [vmem:[%s210_s0 + $0x10] sm:$0xff] }
   0x3   :  { %142 = vmatpush3.bf16.msra.mxu0 %v150_v0  ;;  %v29_v6 = vpack.c.bf16 %v27_v4, %v26_v3  ;;  %v30_v7 = vpack.c.bf16 %v28_v5, %v28_v5  ;;  %v136_v18 = vld [vmem:[%s211_s2] ss:$0 sm:$0xff] }
   0x4   :  { %143 = vmatprep.subr.bf16.mxu0 %v151_v2 }
   0x5   :  { %145 = vmatprep.mubr.msk.bf16.mxu0 %vm47_vm1, %v29_v6 }
   0x7   :  { %144 = vmatpush3.bf16.msra.mxu0 %v151_v2 }
   0x8   :  { %v25_v8 = vld [vmem:[#allocation2 + $0x10] sm:$0xff]  ;;  %v23_v9 = vld [vmem:[#allocation2] sm:$0xff] }
   0x9   :  { %v24_v13 = vld [vmem:[#allocation2 + $0x8] sm:$0xff] }
   0xa   :  { %146 = vmatmul.mubr.msk.bf16.vlgmr.msra.gmra.mrb[0].mxu0 %vm47_vm1, %v30_v7 }
  0xdd   :  { %v147_v10 = vpop.f32.mrb[0].mxu0 }
  0xde   :  { %v104_v11 = vadd.f32 %v147_v10, %v25_v8  ;;  %v88_v12 = vpop.f32.mrb[1].mxu0 }
  0xdf   :  { %v102_v14 = vadd.f32 %v88_v12, %v23_v9  ;;  %v148_v15 = vpop.f32.mrb[2].mxu0 }
  0xe0   :  { %108 = vst.msk [vmem:[#allocation2 + $0x10] sm:$0xff] %vm19_vm0, %v104_v11  ;;  %v91_v16 = vpop.f32.mrb[3].mxu0 }
  0xe1   :  { %106 = vst.msk [vmem:[#allocation2] sm:$0xff] %vm19_vm0, %v102_v14  ;;  %v103_v17 = vadd.f32 %v91_v16, %v24_v13 }
  0xe3   :  { %107 = vst.msk [vmem:[#allocation2 + $0x8] sm:$0xff] %vm19_vm0, %v103_v17 }
  0xe7   :  { %v114_v19 = vld [vmem:[#allocation2 + $0x10] sm:$0xff] }
  0xe8   :  { %v124_v20 = vadd.f32 %v136_v18, %v114_v19  ;;  %v112_v21 = vld [vmem:[#allocation2] sm:$0xff] }
  0xe9   :  { %v122_v22 = vadd.f32 %v136_v18, %v112_v21 }
  0xea   :  { %127 = vst.msk [vmem:[%s212_s3 + $0x10] sm:$0xff] %vm19_vm0, %v124_v20  ;;  %v113_v23 = vld [vmem:[#allocation2 + $0x8] sm:$0xff] }
  0xeb   :  { %125 = vst.msk [vmem:[%s212_s3] sm:$0xff] %vm19_vm0, %v122_v22  ;;  %v123_v24 = vadd.f32 %v136_v18, %v113_v23 }
  0xed   :  { %126 = vst.msk [vmem:[%s212_s3 + $0x8] sm:$0xff] %vm19_vm0, %v123_v24 }

// kernel: transformer_decoder_forward.26
= control target key start
LH: loop header
LB: loop body
LE: loop exit
PB: predicated region body
PF: predicated region fallthrough
CT: control target
= control target key end

     0   :  { %vm28_vm0 = vcmask 261120   ;;  %v222_v0 = vmov 0.0   ;;  %vm223_vm1 = vmmov 0   ;;  %vm68_vm2 = vcmask 523264   ;;  %s308_s1 = inlined_call_operand.vmem [shape: bf16[64,32], index: 1, kind: input, shape index: {}]   ;;  %s309_s0 = inlined_call_operand.vmem [shape: f32[16,64], index: 0, kind: input, shape index: {}]   ;;  %s310_s2 = inlined_call_operand.vmem [shape: f32[1,32], index: 2, kind: input, shape index: {}]   ;;  %s311_s3 = inlined_call_operand.vmem [shape: f32[16,32], index: 3, kind: input, shape index: {}]   ;;  %s312_s4 = inlined_call_operand.vmem [shape: f32[1,32], index: 4, kind: input, shape index: {}]   ;;  %s313_s5 = inlined_call_operand.vmem [shape: f32[1,32], index: 5, kind: input, shape index: {}]   ;;  %s314_s6 = inlined_call_operand.vmem [shape: f32[16,32], index: 6, kind: output, shape index: {}]  }
   0x1   :  { %200 = vmatprep.subr.bf16.mxu0 %v222_v0  ;;  %v214_v1 = vld [vmem:[%s308_s1] sm:$0xff]   ;;  %208 = vmatprep.mubr.msk.bf16.mxu0 %vm223_vm1, %v222_v0  ;;  %29 = vst.msk [vmem:[#allocation2] sm:$0xff] %vm28_vm0, %v222_v0  ;;  %30 = vst.msk [vmem:[#allocation2 + $0x8] sm:$0xff] %vm28_vm0, %v222_v0  ;;  %v215_v2 = vld [vmem:[%s308_s1 + $0x8] sm:$0xff]  }
   0x2   :  { %201 = vmatpush3.bf16.msra.mxu0 %v214_v1  ;;  %v216_v3 = vld [vmem:[%s308_s1 + $0x10] sm:$0xff]   ;;  %v217_v4 = vld [vmem:[%s308_s1 + $0x18] sm:$0xff]   ;;  %v33_v5 = vld [vmem:[%s309_s0] sm:$0xff] }
   0x3   :  { %202 = vmatprep.subr.bf16.mxu0 %v222_v0  ;;  %v34_v6 = vld [vmem:[%s309_s0 + $0x8] sm:$0xff]  ;;  %v192_v16 = vld [vmem:[%s310_s2] ss:$0 sm:$0xff] }
   0x4   :  { %v35_v7 = vpack.c.bf16 %v34_v6, %v33_v5  ;;  %v132_v18 = vld [vmem:[%s311_s3] sm:$0xff]  ;;  %v133_v21 = vld [vmem:[%s311_s3 + $0x8] sm:$0xff] }
   0x5   :  { %v193_v44 = vld [vmem:[%s312_s4] ss:$0 sm:$0xff] }
   0x6   :  { %203 = vmatpush3.bf16.msra.mxu0 %v215_v2  ;;  %v194_v46 = vld [vmem:[%s313_s5] ss:$0 sm:$0xff] }
   0x7   :  { %204 = vmatprep.subr.bf16.mxu0 %v222_v0 }
   0x8   :  { %v31_v8 = vld [vmem:[#allocation2] sm:$0xff]  ;;  %v32_v10 = vld [vmem:[#allocation2 + $0x8] sm:$0xff] }
   0xa   :  { %205 = vmatpush3.bf16.msra.mxu0 %v216_v3 }
   0xb   :  { %206 = vmatprep.subr.bf16.mxu0 %v222_v0 }
   0xe   :  { %207 = vmatpush3.bf16.msra.mxu0 %v217_v4 }
  0x11   :  { %209 = vmatmul.mubr.msk.bf16.vlgmr.msra.gmra.mrb[0].mxu0 %vm68_vm2, %v35_v7 }
  0xe4   :  { %v106_v9 = vpop.f32.mrb[0].mxu0 }
  0xe5   :  { %v113_v11 = vadd.f32 %v106_v9, %v31_v8  ;;  %v210_v12 = vpop.f32.mrb[1].mxu0 }
  0xe6   :  { %v109_v13 = vpop.f32.mrb[2].mxu0 }
  0xe7   :  { %116 = vst.msk [vmem:[#allocation2] sm:$0xff] %vm28_vm0, %v113_v11  ;;  %v114_v14 = vadd.f32 %v109_v13, %v32_v10  ;;  %v211_v15 = vpop.f32.mrb[3].mxu0 }
  0xe9   :  { %117 = vst.msk [vmem:[#allocation2 + $0x8] sm:$0xff] %vm28_vm0, %v114_v14 }
  0xee   :  { %v121_v17 = vld [vmem:[#allocation2] sm:$0xff] }
  0xef   :  { %v130_v19 = vadd.f32 %v192_v16, %v121_v17 }
  0xf0   :  { %v122_v20 = vld [vmem:[#allocation2 + $0x8] sm:$0xff] }
  0xf1   :  { %v134_v22 = vadd.f32 %v132_v18, %v130_v19  ;;  %v131_v23 = vadd.f32 %v192_v16, %v122_v20 }
  0xf3   :  { %v136_v24 = vsel %vm28_vm0, %v134_v22, 0.0  ;;  %v135_v25 = vadd.f32 %v133_v21, %v131_v23 }
  0xf4   :  { %137 = vadd.xlane.f32.xlu0 %v136_v24 }
  0xf5   :  { %v139_v26 = vsel %vm28_vm0, %v135_v25, 0.0 }
  0xf8   :  { %140 = vadd.xlane.f32.xlu0 %v139_v26 }
 0x181   :  { %v138_v27 = vpop.xlane.xlu0 %137 }
 0x182   :  { %v143_v28 = vmul.f32 0.03125, %v138_v27 }
 0x184   :  { %v145_v29 = vsub.f32 %v134_v22, %v143_v28 }
 0x185   :  { %v141_v30 = vpop.xlane.xlu0 %140 }
 0x186   :  { %v144_v31 = vmul.f32 0.03125, %v141_v30  ;;  %v147_v32 = vmul.f32 %v145_v29, %v145_v29 }
 0x188   :  { %v146_v33 = vsub.f32 %v135_v25, %v144_v31  ;;  %v149_v34 = vsel %vm28_vm0, %v147_v32, 0.0 }
 0x189   :  { %150 = vadd.xlane.f32.xlu1 %v149_v34 }
 0x18a   :  { %v148_v35 = vmul.f32 %v146_v33, %v146_v33 }
 0x18c   :  { %v152_v36 = vsel %vm28_vm0, %v148_v35, 0.0 }
 0x18d   :  { %153 = vadd.xlane.f32.xlu1 %v152_v36 }
 0x216   :  { %v151_v37 = vpop.xlane.xlu1 %150 }
 0x217   :  { %v155_v38 = vmul.f32 0.03125, %v151_v37 }
 0x219   :  { %v157_v39 = vadd.f32 1e-05, %v155_v38 }
 0x21a   :  { %v154_v40 = vpop.xlane.xlu1 %153 }
 0x21b   :  { %218 = vrsqrt.f32 %v157_v39  ;;  %v156_v41 = vmul.f32 0.03125, %v154_v40 }
 0x21d   :  { %v158_v42 = vadd.f32 1e-05, %v156_v41 }
 0x21f   :  { %220 = vrsqrt.f32 %v158_v42 }
 0x225   :  { %v219_v43 = vpop.eup %218 }
 0x226   :  { %v161_v45 = vmul.f32 %v219_v43, %v145_v29 }
 0x228   :  { %v170_v47 = vmul.f32 %v193_v44, %v161_v45 }
 0x229   :  { %v221_v48 = vpop.eup %220 }
 0x22a   :  { %v179_v49 = vadd.f32 %v194_v46, %v170_v47  ;;  %v162_v50 = vmul.f32 %v221_v48, %v146_v33 }
 0x22c   :  { %181 = vst.msk [vmem:[%s314_s6] sm:$0xff] %vm28_vm0, %v179_v49  ;;  %v171_v51 = vmul.f32 %v193_v44, %v162_v50 }
 0x22e   :  { %v180_v52 = vadd.f32 %v194_v46, %v171_v51 }
 0x230   :  { %182 = vst.msk [vmem:[%s314_s6 + $0x8] sm:$0xff] %vm28_vm0, %v180_v52 }

// kernel: transformer_decoder_forward.25
= control target key start
LH: loop header
LB: loop body
LE: loop exit
PB: predicated region body
PF: predicated region fallthrough
CT: control target
= control target key end

     0   :  { %vm19_vm0 = vcmask 523264   ;;  %v134_v0 = vmov 0.0   ;;  %vm135_vm1 = vmmov 0   ;;  %vm43_vm2 = vcmask 261120   ;;  %s183_s1 = inlined_call_operand.vmem [shape: bf16[32,64], index: 1, kind: input, shape index: {}]   ;;  %s184_s0 = inlined_call_operand.vmem [shape: f32[16,32], index: 0, kind: input, shape index: {}]   ;;  %s185_s2 = inlined_call_operand.vmem [shape: f32[1,64], index: 2, kind: input, shape index: {}]   ;;  %s186_s3 = inlined_call_operand.vmem [shape: f32[16,64], index: 3, kind: output, shape index: {}]  }
   0x1   :  { %122 = vmatprep.subr.bf16.mxu0 %v134_v0  ;;  %v132_v1 = vld [vmem:[%s183_s1] sm:$0xff]   ;;  %126 = vmatprep.mubr.msk.bf16.mxu0 %vm135_vm1, %v134_v0  ;;  %20 = vst.msk [vmem:[#allocation2] sm:$0xff] %vm19_vm0, %v134_v0  ;;  %21 = vst.msk [vmem:[#allocation2 + $0x8] sm:$0xff] %vm19_vm0, %v134_v0  ;;  %v133_v2 = vld [vmem:[%s183_s1 + $0x8] sm:$0xff]  }
   0x2   :  { %123 = vmatpush3.bf16.msra.mxu0 %v132_v1  ;;  %v24_v3 = vld [vmem:[%s184_s0] sm:$0xff]  ;;  %v25_v4 = vld [vmem:[%s184_s0 + $0x8] sm:$0xff] }
   0x3   :  { %124 = vmatprep.subr.bf16.mxu0 %v134_v0  ;;  %v26_v5 = vpack.c.bf16 %v25_v4, %v24_v3  ;;  %v118_v14 = vld [vmem:[%s185_s2] ss:$0 sm:$0xff] }
   0x6   :  { %125 = vmatpush3.bf16.msra.mxu0 %v133_v2 }
   0x8   :  { %v22_v6 = vld [vmem:[#allocation2] sm:$0xff]  ;;  %v23_v8 = vld [vmem:[#allocation2 + $0x8] sm:$0xff] }
   0x9   :  { %127 = vmatmul.mubr.msk.bf16.vlgmr.msra.gmra.mrb[0].mxu0 %vm43_vm2, %v26_v5 }
  0xdc   :  { %v81_v7 = vpop.f32.mrb[0].mxu0 }
  0xdd   :  { %v88_v9 = vadd.f32 %v81_v7, %v22_v6  ;;  %v128_v10 = vpop.f32.mrb[1].mxu0 }
  0xde   :  { %v84_v11 = vpop.f32.mrb[2].mxu0 }
  0xdf   :  { %91 = vst.msk [vmem:[#allocation2] sm:$0xff] %vm19_vm0, %v88_v9  ;;  %v89_v12 = vadd.f32 %v84_v11, %v23_v8  ;;  %v129_v13 = vpop.f32.mrb[3].mxu0 }
  0xe1   :  { %92 = vst.msk [vmem:[#allocation2 + $0x8] sm:$0xff] %vm19_vm0, %v89_v12 }
  0xe6   :  { %v96_v15 = vld [vmem:[#allocation2] sm:$0xff] }
  0xe7   :  { %v105_v16 = vadd.f32 %v118_v14, %v96_v15 }
  0xe8   :  { %v97_v17 = vld [vmem:[#allocation2 + $0x8] sm:$0xff] }
  0xe9   :  { %v107_v18 = vmax.f32 %v105_v16, 0.0  ;;  %v106_v19 = vadd.f32 %v118_v14, %v97_v17 }
  0xeb   :  { %109 = vst.msk [vmem:[%s186_s3] sm:$0xff] %vm19_vm0, %v107_v18  ;;  %v108_v20 = vmax.f32 %v106_v19, 0.0 }
  0xed   :  { %110 = vst.msk [vmem:[%s186_s3 + $0x8] sm:$0xff] %vm19_vm0, %v108_v20 }

// kernel: transformer_decoder_forward.35
= control target key start
LH: loop header
LB: loop body
LE: loop exit
PB: predicated region body
PF: predicated region fallthrough
CT: control target
= control target key end

     0   :  { %v262_v1 = vmov 0.0   ;;  %vm263_vm0 = vmmov 0   ;;  %vm29_vm1 = vcmask 261120   ;;  %s357_s0 = inlined_call_operand.vmem [shape: f32[16,64], index: 0, kind: input, shape index: {}]   ;;  %s358_s1 = inlined_call_operand.vmem [shape: bf16[64,32], index: 1, kind: input, shape index: {}]   ;;  %s359_s2 = inlined_call_operand.vmem [shape: f32[1,32], index: 2, kind: input, shape index: {}]   ;;  %s360_s3 = inlined_call_operand.vmem [shape: f32[16,32], index: 3, kind: input, shape index: {}]   ;;  %s361_s4 = inlined_call_operand.vmem [shape: f32[1,32], index: 4, kind: input, shape index: {}]   ;;  %s362_s5 = inlined_call_operand.vmem [shape: f32[1,32], index: 5, kind: input, shape index: {}]   ;;  %s363_s6 = inlined_call_operand.hbm [shape: f32[16,32], index: 6, kind: output, shape index: {}]  }
   0x1   :  { %v230_v0 = vld [vmem:[%s358_s1] sm:$0xff]   ;;  %213 = vmatprep.subr.bf16.mxu0 %v262_v1  ;;  %v231_v2 = vld [vmem:[%s358_s1 + $0x8] sm:$0xff]   ;;  %221 = vmatprep.mubr.msk.bf16.mxu0 %vm263_vm0, %v262_v1  ;;  %30 = vst.msk [vmem:[#allocation2] sm:$0xff] %vm29_vm1, %v262_v1  ;;  %31 = vst.msk [vmem:[#allocation2 + $0x8] sm:$0xff] %vm29_vm1, %v262_v1 }
   0x2   :  { %214 = vmatpush3.bf16.msra.mxu0 %v230_v0 }
   0x3   :  { %215 = vmatprep.subr.bf16.mxu0 %v262_v1 }
   0x4   :  { %11 = vsyncpa [#allocation4], 0  ;;  %v232_v3 = vld [vmem:[%s358_s1 + $0x10] sm:$0xff]   ;;  %v233_v4 = vld [vmem:[%s358_s1 + $0x18] sm:$0xff]   ;;  %vm69_vm2 = vcmask 523264   ;;  %s264_s15 = smov [#allocation3]  }
   0x5   :  { %v34_v5 = vld [vmem:[%s357_s0] sm:$0xff]  ;;  %v35_v6 = vld [vmem:[%s357_s0 + $0x8] sm:$0xff]  ;;  %s189_s16 = sshll.u32 %s264_s15, 4  ;;  %s190_s16 = int_to_ptr.vmem [resolvable:$true] %s189_s16 }
   0x6   :  { %216 = vmatpush3.bf16.msra.mxu0 %v231_v2  ;;  %v36_v7 = vpack.c.bf16 %v35_v6, %v34_v5  ;;  %v205_v16 = vld [vmem:[%s359_s2] ss:$0 sm:$0xff]  ;;  %v134_v21 = vld [vmem:[%s360_s3 + $0x8] sm:$0xff]  ;;  %s238_s17 = scalar_lea.vmem %s190_s16, 256  ;;  %p243_p1 = scmp.lt.s32.totalorder %s190_s16, %s190_s16 }
   0x7   :  { %217 = vmatprep.subr.bf16.mxu0 %v262_v1  ;;  %v133_v18 = vld [vmem:[%s360_s3] sm:$0xff]  ;;  %p239_p0 = scmp.ne.s32.totalorder %s190_s16, %s238_s17  ;;  %p244_p2 = scmp.lt.s32.totalorder %s238_s17, %s238_s17 }
   0x8   :  { %v32_v8 = vld [vmem:[#allocation2] sm:$0xff]  ;;  %v33_v10 = vld [vmem:[#allocation2 + $0x8] sm:$0xff] }
   0x9   :  { %v206_v44 = vld [vmem:[%s361_s4] ss:$0 sm:$0xff]  ;;  %p245_p3 = por %p244_p2, %p243_p1 }
   0xa   :  { %218 = vmatpush3.bf16.msra.mxu0 %v232_v3  ;;  %v207_v46 = vld [vmem:[%s362_s5] ss:$0 sm:$0xff] }
   0xb   :  { %219 = vmatprep.subr.bf16.mxu0 %v262_v1  ;;  %p246_p4 = pnand %p245_p3, %p239_p0 }
   0xe   :  { %220 = vmatpush3.bf16.msra.mxu0 %v233_v4 }
  0x11   :  { %222 = vmatmul.mubr.msk.bf16.vlgmr.msra.gmra.mrb[0].mxu0 %vm69_vm2, %v36_v7 }
  0xe4   :  { %v107_v9 = vpop.f32.mrb[0].mxu0 }
  0xe5   :  { %v114_v11 = vadd.f32 %v107_v9, %v32_v8  ;;  %v223_v12 = vpop.f32.mrb[1].mxu0 }
  0xe6   :  { %v110_v13 = vpop.f32.mrb[2].mxu0 }
  0xe7   :  { %117 = vst.msk [vmem:[#allocation2] sm:$0xff] %vm29_vm1, %v114_v11  ;;  %v115_v14 = vadd.f32 %v110_v13, %v33_v10  ;;  %v224_v15 = vpop.f32.mrb[3].mxu0 }
  0xe9   :  { %118 = vst.msk [vmem:[#allocation2 + $0x8] sm:$0xff] %vm29_vm1, %v115_v14 }
  0xee   :  { %v122_v17 = vld [vmem:[#allocation2] sm:$0xff] }
  0xef   :  { %v131_v19 = vadd.f32 %v205_v16, %v122_v17 }
  0xf0   :  { %v123_v20 = vld [vmem:[#allocation2 + $0x8] sm:$0xff] }
  0xf1   :  { %v135_v22 = vadd.f32 %v133_v18, %v131_v19  ;;  %v132_v23 = vadd.f32 %v205_v16, %v123_v20 }
  0xf3   :  { %v137_v24 = vsel %vm29_vm1, %v135_v22, 0.0  ;;  %v136_v25 = vadd.f32 %v134_v21, %v132_v23 }
  0xf4   :  { %138 = vadd.xlane.f32.xlu0 %v137_v24 }
  0xf5   :  { %v140_v26 = vsel %vm29_vm1, %v136_v25, 0.0 }
  0xf8   :  { %141 = vadd.xlane.f32.xlu0 %v140_v26 }
 0x181   :  { %v139_v27 = vpop.xlane.xlu0 %138 }
 0x182   :  { %v144_v28 = vmul.f32 0.03125, %v139_v27 }
 0x184   :  { %v146_v29 = vsub.f32 %v135_v22, %v144_v28 }
 0x185   :  { %v142_v30 = vpop.xlane.xlu0 %141 }
 0x186   :  { %v145_v31 = vmul.f32 0.03125, %v142_v30  ;;  %v148_v32 = vmul.f32 %v146_v29, %v146_v29 }
 0x188   :  { %v147_v33 = vsub.f32 %v136_v25, %v145_v31  ;;  %v150_v34 = vsel %vm29_vm1, %v148_v32, 0.0 }
 0x189   :  { %151 = vadd.xlane.f32.xlu1 %v150_v34 }
 0x18a   :  { %v149_v35 = vmul.f32 %v147_v33, %v147_v33 }
 0x18c   :  { %v153_v36 = vsel %vm29_vm1, %v149_v35, 0.0 }
 0x18d   :  { %154 = vadd.xlane.f32.xlu1 %v153_v36 }
 0x216   :  { %v152_v37 = vpop.xlane.xlu1 %151 }
 0x217   :  { %v156_v38 = vmul.f32 0.03125, %v152_v37 }
 0x219   :  { %v158_v39 = vadd.f32 1e-05, %v156_v38 }
 0x21a   :  { %v155_v40 = vpop.xlane.xlu1 %154 }
 0x21b   :  { %234 = vrsqrt.f32 %v158_v39  ;;  %v157_v41 = vmul.f32 0.03125, %v155_v40 }
 0x21d   :  { %v159_v42 = vadd.f32 1e-05, %v157_v41 }
 0x21f   :  { %236 = vrsqrt.f32 %v159_v42 }
 0x225   :  { %v235_v43 = vpop.eup %234 }
 0x226   :  { %v162_v45 = vmul.f32 %v235_v43, %v146_v29 }
 0x228   :  { %v171_v47 = vmul.f32 %v206_v44, %v162_v45 }
 0x229   :  { %v237_v48 = vpop.eup %236 }
 0x22a   :  { %v163_v49 = vmul.f32 %v237_v48, %v147_v33  ;;  %v180_v50 = vadd.f32 %v207_v46, %v171_v47 }
 0x22c   :  { %v172_v51 = vmul.f32 %v206_v44, %v163_v49  ;;  %182 = vst.msk [vmem:[#allocation3] sm:$0xff] %vm29_vm1, %v180_v50 }
 0x22e   :  { %v181_v52 = vadd.f32 %v207_v46, %v172_v51 }
 0x230   :  { %183 = vst.msk [vmem:[#allocation3 + $0x8] sm:$0xff] %vm29_vm1, %v181_v52 }
 0x231   :  { %249 = shalt.err (!%p246_p4)
}
 0x232   :  { %s250_s18 = scalar_lea.hbm %s363_s6, 256 }
 0x233   :  { %p251_p5 = scmp.ne.s32.totalorder %s363_s6, %s250_s18  ;;  %p254_p6 = scmp.lt.u32.totalorder %s250_s18, %s363_s6 }
 0x235   :  { %p256_p7 = pnand %p254_p6, %p251_p5 }
 0x237   :  { %259 = shalt.err (!%p256_p7)
}
 0x238   :  { %s265_s23 = smov 128   ;;  %s266_s24 = smov 8  }
 0x239   :  { %195 = dma.vmem_to_hbm [thread:$0]  %s190_s16, 256, %s363_s6, [#allocation4], %s265_s23, %s265_s23, %s266_s24  }
 0x23a   :  { %260 = dma.done.wait [#allocation4], 256  }
 0x23b   :  { %261 = vsyncadd [#allocation4], 4294967040 }
 0x23c   :  { %199 = vsyncpa [#allocation4], 1 }

</bundles_post_ra>
